<compile_context>
chip_gen: v5e
topology: v5e:2x2
jax: 0.10.0
libtpu: 0.0.40
codegen_flags: <defaults>
</compile_context>

<pallas_src>
import math

import jax
import jax.numpy as jnp
from jax.experimental import pallas as pl
from jax.experimental.pallas import tpu as pltpu

# ----------------------------- configuration -------------------------------
EMB = 32          # kwargs['emb']
HEADS = 2         # kwargs['heads']
DEPTH = 2         # kwargs['depth']
FF_MULT = 4       # Transformer default ff_hidden_mult
N_OUT = 4         # n_out
INPUT_SIZE = 1    # input_size
EPS = 1e-5        # nn.LayerNorm default eps

BATCH = 2
SEQ = 8


# ------------------------------ kernel helpers ------------------------------
def _layernorm2d(x, gamma, beta):
    # x: (n, e); gamma/beta: (1, e)
    mu = jnp.mean(x, axis=-1, keepdims=True)
    var = jnp.mean((x - mu) ** 2, axis=-1, keepdims=True)
    return (x - mu) * jax.lax.rsqrt(var + EPS) * gamma + beta


# --------------------------------- kernel -----------------------------------
def make_transformer_kernel(batch, seq):
    e = EMB
    hd = e // HEADS
    # (e**-0.25 on q) * (e**-0.25 on k) == 1/sqrt(e) applied once to scores
    scale = 1.0 / math.sqrt(float(e))

    def kernel(xt_ref, consts_ref, wqkv_ref, wu_ref, vecs_ref,
               wf1_ref, bf1_ref, wf2_ref, wp_ref, out_ref):
        # xt_ref: (batch*seq, 2)  lane 0 = magnitude x, lane 1 = time t
        xt = xt_ref[...]
        x = xt[:, 0:1]                                   # (n, 1)
        tt = xt[:, 1:2]                                  # (n, 1)

        consts = consts_ref[...]                         # (5, e)
        div = consts[0:1]                                # (1, e)
        phase = consts[1:2]                              # (1, e)
        w_emb = consts[2:3]                              # (1, e)
        b_emb = consts[3:4]                              # (1, e)
        bp = consts[4:5, :N_OUT]                         # (1, N_OUT)

        # ---- TimePositionalEncoding (the spec module), one sin per element:
        #      even lanes: sin(t*div_half[j//2]);  odd lanes: cos(...) via +pi/2
        pe = jnp.sin(tt * div + phase)                   # (n, e)

        # ---- magnitude embedding: K=1 contraction as a VPU broadcast multiply
        h = x * w_emb + b_emb + pe                       # (n, e)

        # ---- transformer blocks (fully static/unrolled; full LLO visibility)
        for d in range(DEPTH):
            vd = vecs_ref[d]                             # (6, e): bu,g1,be1,g2,be2,bf2
            qkv = jnp.dot(h, wqkv_ref[d],
                          preferred_element_type=jnp.float32)     # (n, 3e)

            att_rows = []
            for b in range(batch):
                r0 = b * seq
                head_outs = []
                for hh in range(HEADS):
                    c = hh * hd
                    q = qkv[r0:r0 + seq, c:c + hd]               # (t, hd)
                    k = qkv[r0:r0 + seq, e + c:e + c + hd]       # (t, hd)
                    v = qkv[r0:r0 + seq, 2 * e + c:2 * e + c + hd]
                    s = jax.lax.dot_general(
                        q, k, (((1,), (1,)), ((), ())),
                        preferred_element_type=jnp.float32) * scale   # (t, t)
                    s = s - jnp.max(s, axis=-1, keepdims=True)
                    p = jnp.exp(s)
                    p = p / jnp.sum(p, axis=-1, keepdims=True)   # exact softmax
                    head_outs.append(
                        jnp.dot(p, v, preferred_element_type=jnp.float32))
                att_rows.append(jnp.concatenate(head_outs, axis=-1))  # (t, e)
            att = jnp.concatenate(att_rows, axis=0)               # (n, e)

            att = jnp.dot(att, wu_ref[d],
                          preferred_element_type=jnp.float32) + vd[0:1]
            h = _layernorm2d(att + h, vd[1:2], vd[2:3])

            ff = jnp.maximum(
                jnp.dot(h, wf1_ref[d], preferred_element_type=jnp.float32)
                + bf1_ref[d][None, :], 0.0)
            ff = (jnp.dot(ff, wf2_ref[d], preferred_element_type=jnp.float32)
                  + vd[5:6])
            h = _layernorm2d(ff + h, vd[3:4], vd[4:5])

        # mean pool per batch (mask is all-ones by default -> mask.sum == seq)
        pooled = jnp.concatenate(
            [jnp.sum(h[b * seq:(b + 1) * seq], axis=0, keepdims=True)
             for b in range(batch)], axis=0) * (1.0 / float(seq))  # (batch, e)

        # single full-array store of the (batch, N_OUT) result
        out_ref[...] = (jnp.dot(pooled, wp_ref[...],
                                preferred_element_type=jnp.float32)
                        + bp).astype(out_ref.dtype)

    return kernel


# ------------------------------ glue (plain JAX) -----------------------------
def init_params(key):
    ks = jax.random.split(key, 12)

    def u(k, shape, fan_in):
        bound = 1.0 / math.sqrt(fan_in)
        return jax.random.uniform(k, shape, jnp.float32, -bound, bound)

    return dict(
        w_emb=u(ks[0], (INPUT_SIZE, EMB), INPUT_SIZE),
        b_emb=u(ks[1], (1, EMB), INPUT_SIZE),
        wq=u(ks[2], (DEPTH, EMB, EMB), EMB),
        wk=u(ks[3], (DEPTH, EMB, EMB), EMB),
        wv=u(ks[4], (DEPTH, EMB, EMB), EMB),
        wu=u(ks[5], (DEPTH, EMB, EMB), EMB),
        bu=u(ks[6], (DEPTH, EMB), EMB),
        g1=jnp.ones((DEPTH, EMB), jnp.float32),
        be1=jnp.zeros((DEPTH, EMB), jnp.float32),
        g2=jnp.ones((DEPTH, EMB), jnp.float32),
        be2=jnp.zeros((DEPTH, EMB), jnp.float32),
        wf1=u(ks[7], (DEPTH, EMB, FF_MULT * EMB), EMB),
        bf1=u(ks[8], (DEPTH, FF_MULT * EMB), EMB),
        wf2=u(ks[9], (DEPTH, FF_MULT * EMB, EMB), FF_MULT * EMB),
        bf2=u(ks[10], (DEPTH, EMB), FF_MULT * EMB),
        wp=u(ks[11], (EMB, N_OUT), EMB),
        bp=jnp.zeros((1, N_OUT), jnp.float32),
    )


def forward_pallas(x, tvec, params):
    b, t, _ = x.shape
    n = b * t

    # merge x and t into a single (n, 2) input slab -> one input DMA
    xt = jnp.concatenate(
        [x.reshape(n, INPUT_SIZE).astype(jnp.float32),
         tvec.reshape(n, 1).astype(jnp.float32)], axis=-1)

    # fuse q/k/v weights: (DEPTH, EMB, 3*EMB)
    wqkv = jnp.concatenate([params['wq'], params['wk'], params['wv']], axis=-1)

    # PE constants: pe = sin(t * div + phase); div repeated in lane pairs,
    # phase = pi/2 on odd lanes (sin(x + pi/2) == cos(x))
    div_half = jnp.exp(jnp.arange(0, EMB, 2, dtype=jnp.float32)
                       * (-math.log(10000.0) / EMB))
    div = jnp.repeat(div_half, 2)[None, :]                       # (1, EMB)
    phase = jnp.tile(jnp.array([0.0, math.pi / 2.0], jnp.float32),
                     EMB // 2)[None, :]                          # (1, EMB)
    bp_pad = jnp.zeros((1, EMB), jnp.float32).at[:, :N_OUT].set(params['bp'])
    consts = jnp.concatenate(
        [div, phase, params['w_emb'], params['b_emb'], bp_pad], axis=0)  # (5, EMB)

    # pack the per-layer EMB-sized vectors into one array: (DEPTH, 6, EMB)
    vecs = jnp.stack([params['bu'], params['g1'], params['be1'],
                      params['g2'], params['be2'], params['bf2']], axis=1)

    args = (xt, consts, wqkv, params['wu'], vecs,
            params['wf1'], params['bf1'], params['wf2'], params['wp'])

    vmem = pl.BlockSpec(memory_space=pltpu.MemorySpace.VMEM)
    # Single invocation (no grid): whole problem is ~110 KB of weights and
    # <10 KB of activations -- latency-bound, so no tiling / pipelining.
    return pl.pallas_call(
        make_transformer_kernel(b, t),
        out_shape=jax.ShapeDtypeStruct((b, N_OUT), jnp.float32),
        in_specs=[vmem] * len(args),
        out_specs=vmem,
    )(*args)


# pure-JAX reference (independent construction, incl. interleaved sin/cos PE)
def time_pos_encoding(tvec, d_emb):
    div = jnp.exp(jnp.arange(0, d_emb, 2, dtype=jnp.float32)
                  * (-math.log(10000.0) / d_emb))
    tt = tvec[:, :, None]
    sin = jnp.sin(tt * div)
    cos = jnp.cos(tt * div)
    return jnp.stack([sin, cos], axis=-1).reshape(tvec.shape[0], tvec.shape[1], d_emb)


def forward_ref(x, tvec, params):
    b, t, _ = x.shape
    temb = time_pos_encoding(tvec, EMB)
    h = jnp.einsum('bti,ie->bte', x, params['w_emb']) + params['b_emb'][None] + temb
    s, scale = EMB // HEADS, 1.0 / (float(EMB) ** 0.25)
    for d in range(DEPTH):
        q = jnp.einsum('bte,ef->btf', h, params['wq'][d]) * scale
        k = jnp.einsum('bte,ef->btf', h, params['wk'][d]) * scale
        v = jnp.einsum('bte,ef->btf', h, params['wv'][d])
        outs = []
        for hh in range(HEADS):
            qs, ks, vs = (a[:, :, hh * s:(hh + 1) * s] for a in (q, k, v))
            att = jax.nn.softmax(jnp.einsum('bqd,bkd->bqk', qs, ks), axis=-1)
            outs.append(jnp.einsum('bqk,bkd->bqd', att, vs))
        att = jnp.concatenate(outs, axis=-1)
        att = jnp.einsum('bte,ef->btf', att, params['wu'][d]) + params['bu'][d][None, None]

        def ln(z, g, bt):
            mu = jnp.mean(z, -1, keepdims=True)
            var = jnp.mean((z - mu) ** 2, -1, keepdims=True)
            return (z - mu) * jax.lax.rsqrt(var + EPS) * g + bt

        h = ln(att + h, params['g1'][d], params['be1'][d])
        ff = jax.nn.relu(jnp.einsum('bte,ef->btf', h, params['wf1'][d]) + params['bf1'][d])
        ff = jnp.einsum('btf,fe->bte', ff, params['wf2'][d]) + params['bf2'][d]
        h = ln(ff + h, params['g2'][d], params['be2'][d])
    pooled = jnp.sum(h, axis=1) / float(t)
    return pooled @ params['wp'] + params['bp']


# TODO(synk): agg='attn' branch (fresh nn.MultiheadAttention built inside
# forward) and nband>1 band embedding are not exercised here (defaults:
# agg='mean', nband=1); dropout=0.0 is an identity.

if __name__ == "__main__":
    key = jax.random.PRNGKey(0)
    kx, kt, kp = jax.random.split(key, 3)
    x = jax.random.normal(kx, (BATCH, SEQ, INPUT_SIZE), dtype=jnp.float32)
    tvec = jax.random.uniform(kt, (BATCH, SEQ), jnp.float32, 0.0, 20.0)
    params = init_params(kp)

    out = jax.block_until_ready(forward_pallas(x, tvec, params))
    ref = jax.block_until_ready(forward_ref(x, tvec, params))

    assert out.shape == (BATCH, N_OUT)
    max_err = float(jnp.max(jnp.abs(out - ref)))
    assert max_err < 1e-2, f"mismatch vs reference: {max_err}"
    print("KERNEL_OK")
</pallas_src>

<mosaic_0001>
module attributes {stable_mosaic.version = 11 : i64} {
  func.func @kernel(%arg0: memref<16x2xf32, #tpu.memory_space<vmem>>, %arg1: memref<5x32xf32, #tpu.memory_space<vmem>>, %arg2: memref<2x32x96xf32, #tpu.memory_space<vmem>>, %arg3: memref<2x32x32xf32, #tpu.memory_space<vmem>>, %arg4: memref<2x6x32xf32, #tpu.memory_space<vmem>>, %arg5: memref<2x32x128xf32, #tpu.memory_space<vmem>>, %arg6: memref<2x128xf32, #tpu.memory_space<vmem>>, %arg7: memref<2x128x32xf32, #tpu.memory_space<vmem>>, %arg8: memref<32x4xf32, #tpu.memory_space<vmem>>, %arg9: memref<2x4xf32, #tpu.memory_space<vmem>>) attributes {dimension_semantics = [], scalar_prefetch = 0 : i64, scratch_operands = 0 : i64, tpu.core_type = #tpu.core_type<tc>} {
    %c0 = arith.constant 0 : index
    %c0_0 = arith.constant 0 : index
    %0 = vector.load %arg0[%c0, %c0_0] : memref<16x2xf32, #tpu.memory_space<vmem>>, vector<16x2xf32>
    %1 = vector.extract_strided_slice %0 {offsets = [0, 0], sizes = [16, 1], strides = [1, 1]} : vector<16x2xf32> to vector<16x1xf32>
    %2 = vector.extract_strided_slice %0 {offsets = [0, 1], sizes = [16, 1], strides = [1, 1]} : vector<16x2xf32> to vector<16x1xf32>
    %c0_1 = arith.constant 0 : index
    %c0_2 = arith.constant 0 : index
    %3 = vector.load %arg1[%c0_1, %c0_2] : memref<5x32xf32, #tpu.memory_space<vmem>>, vector<5x32xf32>
    %4 = vector.extract_strided_slice %3 {offsets = [0, 0], sizes = [1, 32], strides = [1, 1]} : vector<5x32xf32> to vector<1x32xf32>
    %5 = vector.extract_strided_slice %3 {offsets = [1, 0], sizes = [1, 32], strides = [1, 1]} : vector<5x32xf32> to vector<1x32xf32>
    %6 = vector.extract_strided_slice %3 {offsets = [2, 0], sizes = [1, 32], strides = [1, 1]} : vector<5x32xf32> to vector<1x32xf32>
    %7 = vector.extract_strided_slice %3 {offsets = [3, 0], sizes = [1, 32], strides = [1, 1]} : vector<5x32xf32> to vector<1x32xf32>
    %8 = vector.extract_strided_slice %3 {offsets = [4, 0], sizes = [1, 4], strides = [1, 1]} : vector<5x32xf32> to vector<1x4xf32>
    %9 = vector.broadcast %2 : vector<16x1xf32> to vector<16x32xf32>
    %10 = vector.broadcast %4 : vector<1x32xf32> to vector<16x32xf32>
    %11 = arith.mulf %9, %10 : vector<16x32xf32>
    %12 = vector.broadcast %5 : vector<1x32xf32> to vector<16x32xf32>
    %13 = arith.addf %11, %12 : vector<16x32xf32>
    %14 = math.sin %13 : vector<16x32xf32>
    %15 = vector.broadcast %1 : vector<16x1xf32> to vector<16x32xf32>
    %16 = vector.broadcast %6 : vector<1x32xf32> to vector<16x32xf32>
    %17 = arith.mulf %15, %16 : vector<16x32xf32>
    %18 = vector.broadcast %7 : vector<1x32xf32> to vector<16x32xf32>
    %19 = arith.addf %17, %18 : vector<16x32xf32>
    %20 = arith.addf %19, %14 : vector<16x32xf32>
    %c0_3 = arith.constant 0 : index
    %c0_4 = arith.constant 0 : index
    %c0_5 = arith.constant 0 : index
    %21 = vector.load %arg4[%c0_3, %c0_4, %c0_5] : memref<2x6x32xf32, #tpu.memory_space<vmem>>, vector<1x6x32xf32>
    %22 = vector.shape_cast %21 : vector<1x6x32xf32> to vector<6x32xf32>
    %c0_6 = arith.constant 0 : index
    %c0_7 = arith.constant 0 : index
    %c0_8 = arith.constant 0 : index
    %23 = vector.load %arg2[%c0_6, %c0_7, %c0_8] : memref<2x32x96xf32, #tpu.memory_space<vmem>>, vector<1x32x96xf32>
    %24 = vector.shape_cast %23 : vector<1x32x96xf32> to vector<32x96xf32>
    %cst = arith.constant dense<0.000000e+00> : vector<16x96xf32>
    %25 = tpu.matmul %20, %24, %cst {dimension_numbers = #tpu.dot_dimension_numbers<[1], [0], [0], [1], [0, 0, 1, 1], [], []>} : vector<16x32xf32>, vector<32x96xf32>, vector<16x96xf32> -> vector<16x96xf32>
    %26 = vector.extract_strided_slice %25 {offsets = [0, 0], sizes = [8, 16], strides = [1, 1]} : vector<16x96xf32> to vector<8x16xf32>
    %27 = vector.extract_strided_slice %25 {offsets = [0, 32], sizes = [8, 16], strides = [1, 1]} : vector<16x96xf32> to vector<8x16xf32>
    %28 = vector.extract_strided_slice %25 {offsets = [0, 64], sizes = [8, 16], strides = [1, 1]} : vector<16x96xf32> to vector<8x16xf32>
    %cst_9 = arith.constant dense<0.000000e+00> : vector<8x8xf32>
    %29 = tpu.matmul %26, %27, %cst_9 {dimension_numbers = #tpu.dot_dimension_numbers<[1], [1], [0], [0], [0, 0, 1, 0], [], []>} : vector<8x16xf32>, vector<8x16xf32>, vector<8x8xf32> -> vector<8x8xf32>
    %cst_10 = arith.constant 0.176776692 : f32
    %30 = vector.broadcast %cst_10 : f32 to vector<8x8xf32>
    %31 = arith.mulf %29, %30 : vector<8x8xf32>
    %cst_11 = arith.constant dense<0xFF800000> : vector<8xf32>
    %32 = vector.multi_reduction <maximumf>, %31, %cst_11 [1] : vector<8x8xf32> to vector<8xf32>
    %33 = vector.shape_cast %32 : vector<8xf32> to vector<8x1xf32>
    %34 = vector.broadcast %33 : vector<8x1xf32> to vector<8x8xf32>
    %35 = arith.subf %31, %34 : vector<8x8xf32>
    %36 = math.exp %35 : vector<8x8xf32>
    %cst_12 = arith.constant dense<0.000000e+00> : vector<8xf32>
    %37 = vector.multi_reduction <add>, %36, %cst_12 [1] : vector<8x8xf32> to vector<8xf32>
    %38 = vector.shape_cast %37 : vector<8xf32> to vector<8x1xf32>
    %39 = vector.broadcast %38 : vector<8x1xf32> to vector<8x8xf32>
    %40 = arith.divf %36, %39 : vector<8x8xf32>
    %cst_13 = arith.constant dense<0.000000e+00> : vector<8x16xf32>
    %41 = tpu.matmul %40, %28, %cst_13 {dimension_numbers = #tpu.dot_dimension_numbers<[1], [0], [0], [1], [0, 0, 1, 1], [], []>} : vector<8x8xf32>, vector<8x16xf32>, vector<8x16xf32> -> vector<8x16xf32>
    %42 = vector.extract_strided_slice %25 {offsets = [0, 16], sizes = [8, 16], strides = [1, 1]} : vector<16x96xf32> to vector<8x16xf32>
    %43 = vector.extract_strided_slice %25 {offsets = [0, 48], sizes = [8, 16], strides = [1, 1]} : vector<16x96xf32> to vector<8x16xf32>
    %44 = vector.extract_strided_slice %25 {offsets = [0, 80], sizes = [8, 16], strides = [1, 1]} : vector<16x96xf32> to vector<8x16xf32>
    %cst_14 = arith.constant dense<0.000000e+00> : vector<8x8xf32>
    %45 = tpu.matmul %42, %43, %cst_14 {dimension_numbers = #tpu.dot_dimension_numbers<[1], [1], [0], [0], [0, 0, 1, 0], [], []>} : vector<8x16xf32>, vector<8x16xf32>, vector<8x8xf32> -> vector<8x8xf32>
    %cst_15 = arith.constant 0.176776692 : f32
    %46 = vector.broadcast %cst_15 : f32 to vector<8x8xf32>
    %47 = arith.mulf %45, %46 : vector<8x8xf32>
    %cst_16 = arith.constant dense<0xFF800000> : vector<8xf32>
    %48 = vector.multi_reduction <maximumf>, %47, %cst_16 [1] : vector<8x8xf32> to vector<8xf32>
    %49 = vector.shape_cast %48 : vector<8xf32> to vector<8x1xf32>
    %50 = vector.broadcast %49 : vector<8x1xf32> to vector<8x8xf32>
    %51 = arith.subf %47, %50 : vector<8x8xf32>
    %52 = math.exp %51 : vector<8x8xf32>
    %cst_17 = arith.constant dense<0.000000e+00> : vector<8xf32>
    %53 = vector.multi_reduction <add>, %52, %cst_17 [1] : vector<8x8xf32> to vector<8xf32>
    %54 = vector.shape_cast %53 : vector<8xf32> to vector<8x1xf32>
    %55 = vector.broadcast %54 : vector<8x1xf32> to vector<8x8xf32>
    %56 = arith.divf %52, %55 : vector<8x8xf32>
    %cst_18 = arith.constant dense<0.000000e+00> : vector<8x16xf32>
    %57 = tpu.matmul %56, %44, %cst_18 {dimension_numbers = #tpu.dot_dimension_numbers<[1], [0], [0], [1], [0, 0, 1, 1], [], []>} : vector<8x8xf32>, vector<8x16xf32>, vector<8x16xf32> -> vector<8x16xf32>
    %58 = tpu.concatenate %41, %57 in 1 : vector<8x16xf32>, vector<8x16xf32> -> vector<8x32xf32>
    %59 = vector.extract_strided_slice %25 {offsets = [8, 0], sizes = [8, 16], strides = [1, 1]} : vector<16x96xf32> to vector<8x16xf32>
    %60 = vector.extract_strided_slice %25 {offsets = [8, 32], sizes = [8, 16], strides = [1, 1]} : vector<16x96xf32> to vector<8x16xf32>
    %61 = vector.extract_strided_slice %25 {offsets = [8, 64], sizes = [8, 16], strides = [1, 1]} : vector<16x96xf32> to vector<8x16xf32>
    %cst_19 = arith.constant dense<0.000000e+00> : vector<8x8xf32>
    %62 = tpu.matmul %59, %60, %cst_19 {dimension_numbers = #tpu.dot_dimension_numbers<[1], [1], [0], [0], [0, 0, 1, 0], [], []>} : vector<8x16xf32>, vector<8x16xf32>, vector<8x8xf32> -> vector<8x8xf32>
    %cst_20 = arith.constant 0.176776692 : f32
    %63 = vector.broadcast %cst_20 : f32 to vector<8x8xf32>
    %64 = arith.mulf %62, %63 : vector<8x8xf32>
    %cst_21 = arith.constant dense<0xFF800000> : vector<8xf32>
    %65 = vector.multi_reduction <maximumf>, %64, %cst_21 [1] : vector<8x8xf32> to vector<8xf32>
    %66 = vector.shape_cast %65 : vector<8xf32> to vector<8x1xf32>
    %67 = vector.broadcast %66 : vector<8x1xf32> to vector<8x8xf32>
    %68 = arith.subf %64, %67 : vector<8x8xf32>
    %69 = math.exp %68 : vector<8x8xf32>
    %cst_22 = arith.constant dense<0.000000e+00> : vector<8xf32>
    %70 = vector.multi_reduction <add>, %69, %cst_22 [1] : vector<8x8xf32> to vector<8xf32>
    %71 = vector.shape_cast %70 : vector<8xf32> to vector<8x1xf32>
    %72 = vector.broadcast %71 : vector<8x1xf32> to vector<8x8xf32>
    %73 = arith.divf %69, %72 : vector<8x8xf32>
    %cst_23 = arith.constant dense<0.000000e+00> : vector<8x16xf32>
    %74 = tpu.matmul %73, %61, %cst_23 {dimension_numbers = #tpu.dot_dimension_numbers<[1], [0], [0], [1], [0, 0, 1, 1], [], []>} : vector<8x8xf32>, vector<8x16xf32>, vector<8x16xf32> -> vector<8x16xf32>
    %75 = vector.extract_strided_slice %25 {offsets = [8, 16], sizes = [8, 16], strides = [1, 1]} : vector<16x96xf32> to vector<8x16xf32>
    %76 = vector.extract_strided_slice %25 {offsets = [8, 48], sizes = [8, 16], strides = [1, 1]} : vector<16x96xf32> to vector<8x16xf32>
    %77 = vector.extract_strided_slice %25 {offsets = [8, 80], sizes = [8, 16], strides = [1, 1]} : vector<16x96xf32> to vector<8x16xf32>
    %cst_24 = arith.constant dense<0.000000e+00> : vector<8x8xf32>
    %78 = tpu.matmul %75, %76, %cst_24 {dimension_numbers = #tpu.dot_dimension_numbers<[1], [1], [0], [0], [0, 0, 1, 0], [], []>} : vector<8x16xf32>, vector<8x16xf32>, vector<8x8xf32> -> vector<8x8xf32>
    %cst_25 = arith.constant 0.176776692 : f32
    %79 = vector.broadcast %cst_25 : f32 to vector<8x8xf32>
    %80 = arith.mulf %78, %79 : vector<8x8xf32>
    %cst_26 = arith.constant dense<0xFF800000> : vector<8xf32>
    %81 = vector.multi_reduction <maximumf>, %80, %cst_26 [1] : vector<8x8xf32> to vector<8xf32>
    %82 = vector.shape_cast %81 : vector<8xf32> to vector<8x1xf32>
    %83 = vector.broadcast %82 : vector<8x1xf32> to vector<8x8xf32>
    %84 = arith.subf %80, %83 : vector<8x8xf32>
    %85 = math.exp %84 : vector<8x8xf32>
    %cst_27 = arith.constant dense<0.000000e+00> : vector<8xf32>
    %86 = vector.multi_reduction <add>, %85, %cst_27 [1] : vector<8x8xf32> to vector<8xf32>
    %87 = vector.shape_cast %86 : vector<8xf32> to vector<8x1xf32>
    %88 = vector.broadcast %87 : vector<8x1xf32> to vector<8x8xf32>
    %89 = arith.divf %85, %88 : vector<8x8xf32>
    %cst_28 = arith.constant dense<0.000000e+00> : vector<8x16xf32>
    %90 = tpu.matmul %89, %77, %cst_28 {dimension_numbers = #tpu.dot_dimension_numbers<[1], [0], [0], [1], [0, 0, 1, 1], [], []>} : vector<8x8xf32>, vector<8x16xf32>, vector<8x16xf32> -> vector<8x16xf32>
    %91 = tpu.concatenate %74, %90 in 1 : vector<8x16xf32>, vector<8x16xf32> -> vector<8x32xf32>
    %92 = tpu.concatenate %58, %91 in 0 : vector<8x32xf32>, vector<8x32xf32> -> vector<16x32xf32>
    %c0_29 = arith.constant 0 : index
    %c0_30 = arith.constant 0 : index
    %c0_31 = arith.constant 0 : index
    %93 = vector.load %arg3[%c0_29, %c0_30, %c0_31] : memref<2x32x32xf32, #tpu.memory_space<vmem>>, vector<1x32x32xf32>
    %94 = vector.shape_cast %93 : vector<1x32x32xf32> to vector<32x32xf32>
    %cst_32 = arith.constant dense<0.000000e+00> : vector<16x32xf32>
    %95 = tpu.matmul %92, %94, %cst_32 {dimension_numbers = #tpu.dot_dimension_numbers<[1], [0], [0], [1], [0, 0, 1, 1], [], []>} : vector<16x32xf32>, vector<32x32xf32>, vector<16x32xf32> -> vector<16x32xf32>
    %96 = vector.extract_strided_slice %22 {offsets = [0, 0], sizes = [1, 32], strides = [1, 1]} : vector<6x32xf32> to vector<1x32xf32>
    %97 = vector.broadcast %96 : vector<1x32xf32> to vector<16x32xf32>
    %98 = arith.addf %95, %97 : vector<16x32xf32>
    %99 = arith.addf %98, %20 : vector<16x32xf32>
    %100 = vector.extract_strided_slice %22 {offsets = [1, 0], sizes = [1, 32], strides = [1, 1]} : vector<6x32xf32> to vector<1x32xf32>
    %101 = vector.extract_strided_slice %22 {offsets = [2, 0], sizes = [1, 32], strides = [1, 1]} : vector<6x32xf32> to vector<1x32xf32>
    %cst_33 = arith.constant dense<0.000000e+00> : vector<16xf32>
    %102 = vector.multi_reduction <add>, %99, %cst_33 [1] : vector<16x32xf32> to vector<16xf32>
    %103 = vector.shape_cast %102 : vector<16xf32> to vector<16x1xf32>
    %cst_34 = arith.constant 3.200000e+01 : f32
    %104 = vector.broadcast %cst_34 : f32 to vector<16x1xf32>
    %105 = arith.divf %103, %104 : vector<16x1xf32>
    %106 = vector.broadcast %105 : vector<16x1xf32> to vector<16x32xf32>
    %107 = arith.subf %99, %106 : vector<16x32xf32>
    %108 = arith.mulf %107, %107 : vector<16x32xf32>
    %cst_35 = arith.constant dense<0.000000e+00> : vector<16xf32>
    %109 = vector.multi_reduction <add>, %108, %cst_35 [1] : vector<16x32xf32> to vector<16xf32>
    %110 = vector.shape_cast %109 : vector<16xf32> to vector<16x1xf32>
    %cst_36 = arith.constant 3.200000e+01 : f32
    %111 = vector.broadcast %cst_36 : f32 to vector<16x1xf32>
    %112 = arith.divf %110, %111 : vector<16x1xf32>
    %113 = vector.broadcast %105 : vector<16x1xf32> to vector<16x32xf32>
    %114 = arith.subf %99, %113 : vector<16x32xf32>
    %cst_37 = arith.constant 9.99999974E-6 : f32
    %115 = vector.broadcast %cst_37 : f32 to vector<16x1xf32>
    %116 = arith.addf %112, %115 : vector<16x1xf32>
    %117 = math.rsqrt %116 : vector<16x1xf32>
    %118 = vector.broadcast %117 : vector<16x1xf32> to vector<16x32xf32>
    %119 = arith.mulf %114, %118 : vector<16x32xf32>
    %120 = vector.broadcast %100 : vector<1x32xf32> to vector<16x32xf32>
    %121 = arith.mulf %119, %120 : vector<16x32xf32>
    %122 = vector.broadcast %101 : vector<1x32xf32> to vector<16x32xf32>
    %123 = arith.addf %121, %122 : vector<16x32xf32>
    %c0_38 = arith.constant 0 : index
    %c0_39 = arith.constant 0 : index
    %c0_40 = arith.constant 0 : index
    %124 = vector.load %arg5[%c0_38, %c0_39, %c0_40] : memref<2x32x128xf32, #tpu.memory_space<vmem>>, vector<1x32x128xf32>
    %125 = vector.shape_cast %124 : vector<1x32x128xf32> to vector<32x128xf32>
    %cst_41 = arith.constant dense<0.000000e+00> : vector<16x128xf32>
    %126 = tpu.matmul %123, %125, %cst_41 {dimension_numbers = #tpu.dot_dimension_numbers<[1], [0], [0], [1], [0, 0, 1, 1], [], []>} : vector<16x32xf32>, vector<32x128xf32>, vector<16x128xf32> -> vector<16x128xf32>
    %c0_42 = arith.constant 0 : index
    %c0_43 = arith.constant 0 : index
    %127 = vector.load %arg6[%c0_42, %c0_43] : memref<2x128xf32, #tpu.memory_space<vmem>>, vector<1x128xf32>
    %128 = vector.shape_cast %127 : vector<1x128xf32> to vector<128xf32>
    %129 = vector.shape_cast %128 : vector<128xf32> to vector<1x128xf32>
    %130 = vector.broadcast %129 : vector<1x128xf32> to vector<16x128xf32>
    %131 = arith.addf %126, %130 : vector<16x128xf32>
    %cst_44 = arith.constant 0.000000e+00 : f32
    %132 = vector.broadcast %cst_44 : f32 to vector<16x128xf32>
    %133 = arith.maximumf %131, %132 : vector<16x128xf32>
    %c0_45 = arith.constant 0 : index
    %c0_46 = arith.constant 0 : index
    %c0_47 = arith.constant 0 : index
    %134 = vector.load %arg7[%c0_45, %c0_46, %c0_47] : memref<2x128x32xf32, #tpu.memory_space<vmem>>, vector<1x128x32xf32>
    %135 = vector.shape_cast %134 : vector<1x128x32xf32> to vector<128x32xf32>
    %cst_48 = arith.constant dense<0.000000e+00> : vector<16x32xf32>
    %136 = tpu.matmul %133, %135, %cst_48 {dimension_numbers = #tpu.dot_dimension_numbers<[1], [0], [0], [1], [0, 0, 1, 1], [], []>} : vector<16x128xf32>, vector<128x32xf32>, vector<16x32xf32> -> vector<16x32xf32>
    %137 = vector.extract_strided_slice %22 {offsets = [5, 0], sizes = [1, 32], strides = [1, 1]} : vector<6x32xf32> to vector<1x32xf32>
    %138 = vector.broadcast %137 : vector<1x32xf32> to vector<16x32xf32>
    %139 = arith.addf %136, %138 : vector<16x32xf32>
    %140 = arith.addf %139, %123 : vector<16x32xf32>
    %141 = vector.extract_strided_slice %22 {offsets = [3, 0], sizes = [1, 32], strides = [1, 1]} : vector<6x32xf32> to vector<1x32xf32>
    %142 = vector.extract_strided_slice %22 {offsets = [4, 0], sizes = [1, 32], strides = [1, 1]} : vector<6x32xf32> to vector<1x32xf32>
    %cst_49 = arith.constant dense<0.000000e+00> : vector<16xf32>
    %143 = vector.multi_reduction <add>, %140, %cst_49 [1] : vector<16x32xf32> to vector<16xf32>
    %144 = vector.shape_cast %143 : vector<16xf32> to vector<16x1xf32>
    %cst_50 = arith.constant 3.200000e+01 : f32
    %145 = vector.broadcast %cst_50 : f32 to vector<16x1xf32>
    %146 = arith.divf %144, %145 : vector<16x1xf32>
    %147 = vector.broadcast %146 : vector<16x1xf32> to vector<16x32xf32>
    %148 = arith.subf %140, %147 : vector<16x32xf32>
    %149 = arith.mulf %148, %148 : vector<16x32xf32>
    %cst_51 = arith.constant dense<0.000000e+00> : vector<16xf32>
    %150 = vector.multi_reduction <add>, %149, %cst_51 [1] : vector<16x32xf32> to vector<16xf32>
    %151 = vector.shape_cast %150 : vector<16xf32> to vector<16x1xf32>
    %cst_52 = arith.constant 3.200000e+01 : f32
    %152 = vector.broadcast %cst_52 : f32 to vector<16x1xf32>
    %153 = arith.divf %151, %152 : vector<16x1xf32>
    %154 = vector.broadcast %146 : vector<16x1xf32> to vector<16x32xf32>
    %155 = arith.subf %140, %154 : vector<16x32xf32>
    %cst_53 = arith.constant 9.99999974E-6 : f32
    %156 = vector.broadcast %cst_53 : f32 to vector<16x1xf32>
    %157 = arith.addf %153, %156 : vector<16x1xf32>
    %158 = math.rsqrt %157 : vector<16x1xf32>
    %159 = vector.broadcast %158 : vector<16x1xf32> to vector<16x32xf32>
    %160 = arith.mulf %155, %159 : vector<16x32xf32>
    %161 = vector.broadcast %141 : vector<1x32xf32> to vector<16x32xf32>
    %162 = arith.mulf %160, %161 : vector<16x32xf32>
    %163 = vector.broadcast %142 : vector<1x32xf32> to vector<16x32xf32>
    %164 = arith.addf %162, %163 : vector<16x32xf32>
    %c1 = arith.constant 1 : index
    %c0_54 = arith.constant 0 : index
    %c0_55 = arith.constant 0 : index
    %165 = vector.load %arg4[%c1, %c0_54, %c0_55] : memref<2x6x32xf32, #tpu.memory_space<vmem>>, vector<1x6x32xf32>
    %166 = vector.shape_cast %165 : vector<1x6x32xf32> to vector<6x32xf32>
    %c1_56 = arith.constant 1 : index
    %c0_57 = arith.constant 0 : index
    %c0_58 = arith.constant 0 : index
    %167 = vector.load %arg2[%c1_56, %c0_57, %c0_58] : memref<2x32x96xf32, #tpu.memory_space<vmem>>, vector<1x32x96xf32>
    %168 = vector.shape_cast %167 : vector<1x32x96xf32> to vector<32x96xf32>
    %cst_59 = arith.constant dense<0.000000e+00> : vector<16x96xf32>
    %169 = tpu.matmul %164, %168, %cst_59 {dimension_numbers = #tpu.dot_dimension_numbers<[1], [0], [0], [1], [0, 0, 1, 1], [], []>} : vector<16x32xf32>, vector<32x96xf32>, vector<16x96xf32> -> vector<16x96xf32>
    %170 = vector.extract_strided_slice %169 {offsets = [0, 0], sizes = [8, 16], strides = [1, 1]} : vector<16x96xf32> to vector<8x16xf32>
    %171 = vector.extract_strided_slice %169 {offsets = [0, 32], sizes = [8, 16], strides = [1, 1]} : vector<16x96xf32> to vector<8x16xf32>
    %172 = vector.extract_strided_slice %169 {offsets = [0, 64], sizes = [8, 16], strides = [1, 1]} : vector<16x96xf32> to vector<8x16xf32>
    %cst_60 = arith.constant dense<0.000000e+00> : vector<8x8xf32>
    %173 = tpu.matmul %170, %171, %cst_60 {dimension_numbers = #tpu.dot_dimension_numbers<[1], [1], [0], [0], [0, 0, 1, 0], [], []>} : vector<8x16xf32>, vector<8x16xf32>, vector<8x8xf32> -> vector<8x8xf32>
    %cst_61 = arith.constant 0.176776692 : f32
    %174 = vector.broadcast %cst_61 : f32 to vector<8x8xf32>
    %175 = arith.mulf %173, %174 : vector<8x8xf32>
    %cst_62 = arith.constant dense<0xFF800000> : vector<8xf32>
    %176 = vector.multi_reduction <maximumf>, %175, %cst_62 [1] : vector<8x8xf32> to vector<8xf32>
    %177 = vector.shape_cast %176 : vector<8xf32> to vector<8x1xf32>
    %178 = vector.broadcast %177 : vector<8x1xf32> to vector<8x8xf32>
    %179 = arith.subf %175, %178 : vector<8x8xf32>
    %180 = math.exp %179 : vector<8x8xf32>
    %cst_63 = arith.constant dense<0.000000e+00> : vector<8xf32>
    %181 = vector.multi_reduction <add>, %180, %cst_63 [1] : vector<8x8xf32> to vector<8xf32>
    %182 = vector.shape_cast %181 : vector<8xf32> to vector<8x1xf32>
    %183 = vector.broadcast %182 : vector<8x1xf32> to vector<8x8xf32>
    %184 = arith.divf %180, %183 : vector<8x8xf32>
    %cst_64 = arith.constant dense<0.000000e+00> : vector<8x16xf32>
    %185 = tpu.matmul %184, %172, %cst_64 {dimension_numbers = #tpu.dot_dimension_numbers<[1], [0], [0], [1], [0, 0, 1, 1], [], []>} : vector<8x8xf32>, vector<8x16xf32>, vector<8x16xf32> -> vector<8x16xf32>
    %186 = vector.extract_strided_slice %169 {offsets = [0, 16], sizes = [8, 16], strides = [1, 1]} : vector<16x96xf32> to vector<8x16xf32>
    %187 = vector.extract_strided_slice %169 {offsets = [0, 48], sizes = [8, 16], strides = [1, 1]} : vector<16x96xf32> to vector<8x16xf32>
    %188 = vector.extract_strided_slice %169 {offsets = [0, 80], sizes = [8, 16], strides = [1, 1]} : vector<16x96xf32> to vector<8x16xf32>
    %cst_65 = arith.constant dense<0.000000e+00> : vector<8x8xf32>
    %189 = tpu.matmul %186, %187, %cst_65 {dimension_numbers = #tpu.dot_dimension_numbers<[1], [1], [0], [0], [0, 0, 1, 0], [], []>} : vector<8x16xf32>, vector<8x16xf32>, vector<8x8xf32> -> vector<8x8xf32>
    %cst_66 = arith.constant 0.176776692 : f32
    %190 = vector.broadcast %cst_66 : f32 to vector<8x8xf32>
    %191 = arith.mulf %189, %190 : vector<8x8xf32>
    %cst_67 = arith.constant dense<0xFF800000> : vector<8xf32>
    %192 = vector.multi_reduction <maximumf>, %191, %cst_67 [1] : vector<8x8xf32> to vector<8xf32>
    %193 = vector.shape_cast %192 : vector<8xf32> to vector<8x1xf32>
    %194 = vector.broadcast %193 : vector<8x1xf32> to vector<8x8xf32>
    %195 = arith.subf %191, %194 : vector<8x8xf32>
    %196 = math.exp %195 : vector<8x8xf32>
    %cst_68 = arith.constant dense<0.000000e+00> : vector<8xf32>
    %197 = vector.multi_reduction <add>, %196, %cst_68 [1] : vector<8x8xf32> to vector<8xf32>
    %198 = vector.shape_cast %197 : vector<8xf32> to vector<8x1xf32>
    %199 = vector.broadcast %198 : vector<8x1xf32> to vector<8x8xf32>
    %200 = arith.divf %196, %199 : vector<8x8xf32>
    %cst_69 = arith.constant dense<0.000000e+00> : vector<8x16xf32>
    %201 = tpu.matmul %200, %188, %cst_69 {dimension_numbers = #tpu.dot_dimension_numbers<[1], [0], [0], [1], [0, 0, 1, 1], [], []>} : vector<8x8xf32>, vector<8x16xf32>, vector<8x16xf32> -> vector<8x16xf32>
    %202 = tpu.concatenate %185, %201 in 1 : vector<8x16xf32>, vector<8x16xf32> -> vector<8x32xf32>
    %203 = vector.extract_strided_slice %169 {offsets = [8, 0], sizes = [8, 16], strides = [1, 1]} : vector<16x96xf32> to vector<8x16xf32>
    %204 = vector.extract_strided_slice %169 {offsets = [8, 32], sizes = [8, 16], strides = [1, 1]} : vector<16x96xf32> to vector<8x16xf32>
    %205 = vector.extract_strided_slice %169 {offsets = [8, 64], sizes = [8, 16], strides = [1, 1]} : vector<16x96xf32> to vector<8x16xf32>
    %cst_70 = arith.constant dense<0.000000e+00> : vector<8x8xf32>
    %206 = tpu.matmul %203, %204, %cst_70 {dimension_numbers = #tpu.dot_dimension_numbers<[1], [1], [0], [0], [0, 0, 1, 0], [], []>} : vector<8x16xf32>, vector<8x16xf32>, vector<8x8xf32> -> vector<8x8xf32>
    %cst_71 = arith.constant 0.176776692 : f32
    %207 = vector.broadcast %cst_71 : f32 to vector<8x8xf32>
    %208 = arith.mulf %206, %207 : vector<8x8xf32>
    %cst_72 = arith.constant dense<0xFF800000> : vector<8xf32>
    %209 = vector.multi_reduction <maximumf>, %208, %cst_72 [1] : vector<8x8xf32> to vector<8xf32>
    %210 = vector.shape_cast %209 : vector<8xf32> to vector<8x1xf32>
    %211 = vector.broadcast %210 : vector<8x1xf32> to vector<8x8xf32>
    %212 = arith.subf %208, %211 : vector<8x8xf32>
    %213 = math.exp %212 : vector<8x8xf32>
    %cst_73 = arith.constant dense<0.000000e+00> : vector<8xf32>
    %214 = vector.multi_reduction <add>, %213, %cst_73 [1] : vector<8x8xf32> to vector<8xf32>
    %215 = vector.shape_cast %214 : vector<8xf32> to vector<8x1xf32>
    %216 = vector.broadcast %215 : vector<8x1xf32> to vector<8x8xf32>
    %217 = arith.divf %213, %216 : vector<8x8xf32>
    %cst_74 = arith.constant dense<0.000000e+00> : vector<8x16xf32>
    %218 = tpu.matmul %217, %205, %cst_74 {dimension_numbers = #tpu.dot_dimension_numbers<[1], [0], [0], [1], [0, 0, 1, 1], [], []>} : vector<8x8xf32>, vector<8x16xf32>, vector<8x16xf32> -> vector<8x16xf32>
    %219 = vector.extract_strided_slice %169 {offsets = [8, 16], sizes = [8, 16], strides = [1, 1]} : vector<16x96xf32> to vector<8x16xf32>
    %220 = vector.extract_strided_slice %169 {offsets = [8, 48], sizes = [8, 16], strides = [1, 1]} : vector<16x96xf32> to vector<8x16xf32>
    %221 = vector.extract_strided_slice %169 {offsets = [8, 80], sizes = [8, 16], strides = [1, 1]} : vector<16x96xf32> to vector<8x16xf32>
    %cst_75 = arith.constant dense<0.000000e+00> : vector<8x8xf32>
    %222 = tpu.matmul %219, %220, %cst_75 {dimension_numbers = #tpu.dot_dimension_numbers<[1], [1], [0], [0], [0, 0, 1, 0], [], []>} : vector<8x16xf32>, vector<8x16xf32>, vector<8x8xf32> -> vector<8x8xf32>
    %cst_76 = arith.constant 0.176776692 : f32
    %223 = vector.broadcast %cst_76 : f32 to vector<8x8xf32>
    %224 = arith.mulf %222, %223 : vector<8x8xf32>
    %cst_77 = arith.constant dense<0xFF800000> : vector<8xf32>
    %225 = vector.multi_reduction <maximumf>, %224, %cst_77 [1] : vector<8x8xf32> to vector<8xf32>
    %226 = vector.shape_cast %225 : vector<8xf32> to vector<8x1xf32>
    %227 = vector.broadcast %226 : vector<8x1xf32> to vector<8x8xf32>
    %228 = arith.subf %224, %227 : vector<8x8xf32>
    %229 = math.exp %228 : vector<8x8xf32>
    %cst_78 = arith.constant dense<0.000000e+00> : vector<8xf32>
    %230 = vector.multi_reduction <add>, %229, %cst_78 [1] : vector<8x8xf32> to vector<8xf32>
    %231 = vector.shape_cast %230 : vector<8xf32> to vector<8x1xf32>
    %232 = vector.broadcast %231 : vector<8x1xf32> to vector<8x8xf32>
    %233 = arith.divf %229, %232 : vector<8x8xf32>
    %cst_79 = arith.constant dense<0.000000e+00> : vector<8x16xf32>
    %234 = tpu.matmul %233, %221, %cst_79 {dimension_numbers = #tpu.dot_dimension_numbers<[1], [0], [0], [1], [0, 0, 1, 1], [], []>} : vector<8x8xf32>, vector<8x16xf32>, vector<8x16xf32> -> vector<8x16xf32>
    %235 = tpu.concatenate %218, %234 in 1 : vector<8x16xf32>, vector<8x16xf32> -> vector<8x32xf32>
    %236 = tpu.concatenate %202, %235 in 0 : vector<8x32xf32>, vector<8x32xf32> -> vector<16x32xf32>
    %c1_80 = arith.constant 1 : index
    %c0_81 = arith.constant 0 : index
    %c0_82 = arith.constant 0 : index
    %237 = vector.load %arg3[%c1_80, %c0_81, %c0_82] : memref<2x32x32xf32, #tpu.memory_space<vmem>>, vector<1x32x32xf32>
    %238 = vector.shape_cast %237 : vector<1x32x32xf32> to vector<32x32xf32>
    %cst_83 = arith.constant dense<0.000000e+00> : vector<16x32xf32>
    %239 = tpu.matmul %236, %238, %cst_83 {dimension_numbers = #tpu.dot_dimension_numbers<[1], [0], [0], [1], [0, 0, 1, 1], [], []>} : vector<16x32xf32>, vector<32x32xf32>, vector<16x32xf32> -> vector<16x32xf32>
    %240 = vector.extract_strided_slice %166 {offsets = [0, 0], sizes = [1, 32], strides = [1, 1]} : vector<6x32xf32> to vector<1x32xf32>
    %241 = vector.broadcast %240 : vector<1x32xf32> to vector<16x32xf32>
    %242 = arith.addf %239, %241 : vector<16x32xf32>
    %243 = arith.addf %242, %164 : vector<16x32xf32>
    %244 = vector.extract_strided_slice %166 {offsets = [1, 0], sizes = [1, 32], strides = [1, 1]} : vector<6x32xf32> to vector<1x32xf32>
    %245 = vector.extract_strided_slice %166 {offsets = [2, 0], sizes = [1, 32], strides = [1, 1]} : vector<6x32xf32> to vector<1x32xf32>
    %cst_84 = arith.constant dense<0.000000e+00> : vector<16xf32>
    %246 = vector.multi_reduction <add>, %243, %cst_84 [1] : vector<16x32xf32> to vector<16xf32>
    %247 = vector.shape_cast %246 : vector<16xf32> to vector<16x1xf32>
    %cst_85 = arith.constant 3.200000e+01 : f32
    %248 = vector.broadcast %cst_85 : f32 to vector<16x1xf32>
    %249 = arith.divf %247, %248 : vector<16x1xf32>
    %250 = vector.broadcast %249 : vector<16x1xf32> to vector<16x32xf32>
    %251 = arith.subf %243, %250 : vector<16x32xf32>
    %252 = arith.mulf %251, %251 : vector<16x32xf32>
    %cst_86 = arith.constant dense<0.000000e+00> : vector<16xf32>
    %253 = vector.multi_reduction <add>, %252, %cst_86 [1] : vector<16x32xf32> to vector<16xf32>
    %254 = vector.shape_cast %253 : vector<16xf32> to vector<16x1xf32>
    %cst_87 = arith.constant 3.200000e+01 : f32
    %255 = vector.broadcast %cst_87 : f32 to vector<16x1xf32>
    %256 = arith.divf %254, %255 : vector<16x1xf32>
    %257 = vector.broadcast %249 : vector<16x1xf32> to vector<16x32xf32>
    %258 = arith.subf %243, %257 : vector<16x32xf32>
    %cst_88 = arith.constant 9.99999974E-6 : f32
    %259 = vector.broadcast %cst_88 : f32 to vector<16x1xf32>
    %260 = arith.addf %256, %259 : vector<16x1xf32>
    %261 = math.rsqrt %260 : vector<16x1xf32>
    %262 = vector.broadcast %261 : vector<16x1xf32> to vector<16x32xf32>
    %263 = arith.mulf %258, %262 : vector<16x32xf32>
    %264 = vector.broadcast %244 : vector<1x32xf32> to vector<16x32xf32>
    %265 = arith.mulf %263, %264 : vector<16x32xf32>
    %266 = vector.broadcast %245 : vector<1x32xf32> to vector<16x32xf32>
    %267 = arith.addf %265, %266 : vector<16x32xf32>
    %c1_89 = arith.constant 1 : index
    %c0_90 = arith.constant 0 : index
    %c0_91 = arith.constant 0 : index
    %268 = vector.load %arg5[%c1_89, %c0_90, %c0_91] : memref<2x32x128xf32, #tpu.memory_space<vmem>>, vector<1x32x128xf32>
    %269 = vector.shape_cast %268 : vector<1x32x128xf32> to vector<32x128xf32>
    %cst_92 = arith.constant dense<0.000000e+00> : vector<16x128xf32>
    %270 = tpu.matmul %267, %269, %cst_92 {dimension_numbers = #tpu.dot_dimension_numbers<[1], [0], [0], [1], [0, 0, 1, 1], [], []>} : vector<16x32xf32>, vector<32x128xf32>, vector<16x128xf32> -> vector<16x128xf32>
    %c1_93 = arith.constant 1 : index
    %c0_94 = arith.constant 0 : index
    %271 = vector.load %arg6[%c1_93, %c0_94] : memref<2x128xf32, #tpu.memory_space<vmem>>, vector<1x128xf32>
    %272 = vector.shape_cast %271 : vector<1x128xf32> to vector<128xf32>
    %273 = vector.shape_cast %272 : vector<128xf32> to vector<1x128xf32>
    %274 = vector.broadcast %273 : vector<1x128xf32> to vector<16x128xf32>
    %275 = arith.addf %270, %274 : vector<16x128xf32>
    %cst_95 = arith.constant 0.000000e+00 : f32
    %276 = vector.broadcast %cst_95 : f32 to vector<16x128xf32>
    %277 = arith.maximumf %275, %276 : vector<16x128xf32>
    %c1_96 = arith.constant 1 : index
    %c0_97 = arith.constant 0 : index
    %c0_98 = arith.constant 0 : index
    %278 = vector.load %arg7[%c1_96, %c0_97, %c0_98] : memref<2x128x32xf32, #tpu.memory_space<vmem>>, vector<1x128x32xf32>
    %279 = vector.shape_cast %278 : vector<1x128x32xf32> to vector<128x32xf32>
    %cst_99 = arith.constant dense<0.000000e+00> : vector<16x32xf32>
    %280 = tpu.matmul %277, %279, %cst_99 {dimension_numbers = #tpu.dot_dimension_numbers<[1], [0], [0], [1], [0, 0, 1, 1], [], []>} : vector<16x128xf32>, vector<128x32xf32>, vector<16x32xf32> -> vector<16x32xf32>
    %281 = vector.extract_strided_slice %166 {offsets = [5, 0], sizes = [1, 32], strides = [1, 1]} : vector<6x32xf32> to vector<1x32xf32>
    %282 = vector.broadcast %281 : vector<1x32xf32> to vector<16x32xf32>
    %283 = arith.addf %280, %282 : vector<16x32xf32>
    %284 = arith.addf %283, %267 : vector<16x32xf32>
    %285 = vector.extract_strided_slice %166 {offsets = [3, 0], sizes = [1, 32], strides = [1, 1]} : vector<6x32xf32> to vector<1x32xf32>
    %286 = vector.extract_strided_slice %166 {offsets = [4, 0], sizes = [1, 32], strides = [1, 1]} : vector<6x32xf32> to vector<1x32xf32>
    %cst_100 = arith.constant dense<0.000000e+00> : vector<16xf32>
    %287 = vector.multi_reduction <add>, %284, %cst_100 [1] : vector<16x32xf32> to vector<16xf32>
    %288 = vector.shape_cast %287 : vector<16xf32> to vector<16x1xf32>
    %cst_101 = arith.constant 3.200000e+01 : f32
    %289 = vector.broadcast %cst_101 : f32 to vector<16x1xf32>
    %290 = arith.divf %288, %289 : vector<16x1xf32>
    %291 = vector.broadcast %290 : vector<16x1xf32> to vector<16x32xf32>
    %292 = arith.subf %284, %291 : vector<16x32xf32>
    %293 = arith.mulf %292, %292 : vector<16x32xf32>
    %cst_102 = arith.constant dense<0.000000e+00> : vector<16xf32>
    %294 = vector.multi_reduction <add>, %293, %cst_102 [1] : vector<16x32xf32> to vector<16xf32>
    %295 = vector.shape_cast %294 : vector<16xf32> to vector<16x1xf32>
    %cst_103 = arith.constant 3.200000e+01 : f32
    %296 = vector.broadcast %cst_103 : f32 to vector<16x1xf32>
    %297 = arith.divf %295, %296 : vector<16x1xf32>
    %298 = vector.broadcast %290 : vector<16x1xf32> to vector<16x32xf32>
    %299 = arith.subf %284, %298 : vector<16x32xf32>
    %cst_104 = arith.constant 9.99999974E-6 : f32
    %300 = vector.broadcast %cst_104 : f32 to vector<16x1xf32>
    %301 = arith.addf %297, %300 : vector<16x1xf32>
    %302 = math.rsqrt %301 : vector<16x1xf32>
    %303 = vector.broadcast %302 : vector<16x1xf32> to vector<16x32xf32>
    %304 = arith.mulf %299, %303 : vector<16x32xf32>
    %305 = vector.broadcast %285 : vector<1x32xf32> to vector<16x32xf32>
    %306 = arith.mulf %304, %305 : vector<16x32xf32>
    %307 = vector.broadcast %286 : vector<1x32xf32> to vector<16x32xf32>
    %308 = arith.addf %306, %307 : vector<16x32xf32>
    %309 = vector.extract_strided_slice %308 {offsets = [0, 0], sizes = [8, 32], strides = [1, 1]} : vector<16x32xf32> to vector<8x32xf32>
    %cst_105 = arith.constant dense<0.000000e+00> : vector<32xf32>
    %310 = vector.multi_reduction <add>, %309, %cst_105 [0] : vector<8x32xf32> to vector<32xf32>
    %311 = vector.shape_cast %310 : vector<32xf32> to vector<1x32xf32>
    %312 = vector.extract_strided_slice %308 {offsets = [8, 0], sizes = [8, 32], strides = [1, 1]} : vector<16x32xf32> to vector<8x32xf32>
    %cst_106 = arith.constant dense<0.000000e+00> : vector<32xf32>
    %313 = vector.multi_reduction <add>, %312, %cst_106 [0] : vector<8x32xf32> to vector<32xf32>
    %314 = vector.shape_cast %313 : vector<32xf32> to vector<1x32xf32>
    %315 = tpu.concatenate %311, %314 in 0 : vector<1x32xf32>, vector<1x32xf32> -> vector<2x32xf32>
    %cst_107 = arith.constant 1.250000e-01 : f32
    %316 = vector.broadcast %cst_107 : f32 to vector<2x32xf32>
    %317 = arith.mulf %315, %316 : vector<2x32xf32>
    %c0_108 = arith.constant 0 : index
    %c0_109 = arith.constant 0 : index
    %318 = vector.load %arg8[%c0_108, %c0_109] : memref<32x4xf32, #tpu.memory_space<vmem>>, vector<32x4xf32>
    %cst_110 = arith.constant dense<0.000000e+00> : vector<2x4xf32>
    %319 = tpu.matmul %317, %318, %cst_110 {dimension_numbers = #tpu.dot_dimension_numbers<[1], [0], [0], [1], [0, 0, 1, 1], [], []>} : vector<2x32xf32>, vector<32x4xf32>, vector<2x4xf32> -> vector<2x4xf32>
    %320 = vector.broadcast %8 : vector<1x4xf32> to vector<2x4xf32>
    %321 = arith.addf %319, %320 : vector<2x4xf32>
    %c0_111 = arith.constant 0 : index
    %c0_112 = arith.constant 0 : index
    %322 = vector.load %arg9[%c0_111, %c0_112] : memref<2x4xf32, #tpu.memory_space<vmem>>, vector<2x4xf32>
    tpu.vector_store %arg9[%c0_111, %c0_112], %321 {strides = array<i32>} : memref<2x4xf32, #tpu.memory_space<vmem>>, vector<2x4xf32>,
    return
  }
}

</mosaic_0001>

<bundles_post_ra>
// kernel: tpu_custom_call.1
= control target key start
LH: loop header
LB: loop body
LE: loop exit
PB: predicated region body
PF: predicated region fallthrough
CT: control target
= control target key end

     0   :  { %v1773_v1 = vmov 1   ;;  %v1774_v2 = vmov 0   ;;  %s2417_s0 = inlined_call_operand.vmem [shape: f32[16,2], index: 0, kind: input, shape index: {}]   ;;  %s2418_s1 = inlined_call_operand.vmem [shape: f32[5,32], index: 1, kind: input, shape index: {}]   ;;  %s2419_s2 = inlined_call_operand.vmem [shape: f32[2,32,96], index: 2, kind: input, shape index: {}]   ;;  %s2420_s3 = inlined_call_operand.vmem [shape: f32[2,32,32], index: 3, kind: input, shape index: {}]   ;;  %s2421_s4 = inlined_call_operand.vmem [shape: f32[2,6,32], index: 4, kind: input, shape index: {}]   ;;  %s2422_s5 = inlined_call_operand.vmem [shape: f32[2,32,128], index: 5, kind: input, shape index: {}]   ;;  %s2423_s6 = inlined_call_operand.vmem [shape: f32[2,128], index: 6, kind: input, shape index: {}]   ;;  %s2424_s7 = inlined_call_operand.vmem [shape: f32[2,128,32], index: 7, kind: input, shape index: {}]   ;;  %s2425_s8 = inlined_call_operand.vmem [shape: f32[32,4], index: 8, kind: input, shape index: {}]   ;;  %s2426_s9 = inlined_call_operand.hbm [shape: f32[2,4], index: 9, kind: output, shape index: {}]  }
   0x1   :  { %v33_v0 = vld [vmem:[%s2417_s0] sm:$0xff]  ;;  %1690 = vset.pattern.permute.xlu0 %v1773_v1  ;;  %1692 = vset.pattern.permute.xlu1 %v1773_v1 }
   0x2   :  { %38 = vperm.xlu0 %1690, %v33_v0   ;;  %1693 = vset.pattern.permute.xlu2 %v1774_v2 }
   0x3   :  { %14 = vsyncpa [#allocation3], 0  ;;  %v1847_v3 = vld [vmem:[%s2418_s1] sm:$0x1f]  ;;  %v382_v9 = vld [vmem:[%s2419_s2 + $0x18] sm:$0xff]  ;;  %s1782_s23 = smov 80  }
   0x4   :  { %v46_v4 = vperm.slane %v1847_v3, 0  ;;  %v49_v5 = vperm.slane %v1847_v3, 1  ;;  %v381_v10 = vld [vmem:[%s2419_s2 + $0x10] sm:$0xff]  ;;  %402 = vmatpush.msra.mxu0 %v382_v9  ;;  %v380_v12 = vld [vmem:[%s2419_s2 + $0x8] sm:$0xff]  ;;  %v379_v14 = vld [vmem:[%s2419_s2] sm:$0xff]  ;;  %s1783_s24 = smov 96  }
   0x5   :  { %v1775_v24 = vmov 683565275   ;;  %v1776_v26 = vmov 2475754826   ;;  %v1777_v29 = vmov 2131351028  }
   0x6   :  { %403 = vmatpush.msra.mxu0 %v381_v10  ;;  %v1778_v32 = vmov 2102212464   ;;  %v1779_v35 = vmov 920167782   ;;  %v1780_v38 = vmov 1326507024  }
   0x7   :  { %s1784_s25 = smov 48   ;;  %s1785_s26 = smov 64  }
   0x8   :  { %404 = vmatpush.msra.mxu0 %v380_v12  ;;  %s1786_s27 = smov 16   ;;  %s1788_s21 = smov [#allocation2]  }
   0xa   :  { %1691 = vset.pattern.permute.xlu0 %v1774_v2  ;;  %405 = vmatpush.msra.mxu0 %v379_v14 }
   0xb   :  { %363 = vperm.xlu0 %1691, %v33_v0  }
  0x74   :  { %v39_v6 = vpop.permute.xlu0 %38 }
  0x75   :  { %v47_v7 = vmul.f32 %v46_v4, %v39_v6 }
  0x77   :  { %v1855_v8 = vadd.f32 %v49_v5, %v47_v7 }
  0x79   :  { %v55_v11 = vand.u32 2139095040, %v1855_v8  ;;  %v52_v16 = vand.u32 2147483647, %v1855_v8  ;;  %vm54_vm12 = vcmp.lt.s32.totalorder %v1855_v8, 0 }
  0x7b   :  { %v56_v13 = vshrl.u32 %v55_v11, 23  ;;  %v59_v18 = vand.u32 8388607, %v52_v16  ;;  %vm1940_vm13 = vcmp.le.f32.partialorder %v52_v16, 0.7853982 }
  0x7d   :  { %v1602_v15 = vadd.s32 4294967169, %v56_v13  ;;  %v60_v22 = vor.u32 8388608, %v59_v18 }
  0x7f   :  { %v62_v17 = vadd.s32 1, %v1602_v15  ;;  %v1893_v45 = vshll.u32 %v60_v22, 8 }
  0x81   :  { %vm63_vm0 = vcmp.gt.s32.totalorder %v62_v17, 0  ;;  %v101_v54 = vand.u32 65535, %v1893_v45  ;;  %v102_v55 = vshrl.u32 %v1893_v45, 16 }
  0x82   :  { %v64_v19 = vsel %vm63_vm0, %v62_v17, 0 }
  0x83   :  { %v66_v20 = vand.u32 31, %v64_v19  ;;  %v1875_v23 = vshrl.u32 %v64_v19, 5 }
  0x85   :  { %v1873_v21 = vsub.s32 32, %v66_v20  ;;  %v69_v25 = vshll.u32 %v1775_v24, %v66_v20  ;;  %v72_v27 = vshll.u32 %v1776_v26, %v66_v20  ;;  %v75_v31 = vshll.u32 %v1777_v29, %v66_v20 }
  0x86   :  { %v78_v34 = vshll.u32 %v1778_v32, %v66_v20  ;;  %v81_v37 = vshll.u32 %v1779_v35, %v66_v20  ;;  %vm84_vm1 = vcmp.lt.s32.totalorder %v1875_v23, 1  ;;  %vm87_vm2 = vcmp.lt.s32.totalorder %v1875_v23, 4 }
  0x87   :  { %v70_v28 = vshrl.u32 %v1776_v26, %v1873_v21  ;;  %v73_v30 = vshrl.u32 %v1777_v29, %v1873_v21  ;;  %v76_v33 = vshrl.u32 %v1778_v32, %v1873_v21  ;;  %v79_v36 = vshrl.u32 %v1779_v35, %v1873_v21 }
  0x88   :  { %v82_v39 = vshrl.u32 %v1780_v38, %v1873_v21  ;;  %vm86_vm3 = vcmp.lt.s32.totalorder %v1875_v23, 3  ;;  %vm85_vm4 = vcmp.lt.s32.totalorder %v1875_v23, 2 }
  0x89   :  { %v71_v40 = vor.u32 %v70_v28, %v69_v25  ;;  %v74_v41 = vor.u32 %v73_v30, %v72_v27  ;;  %v77_v42 = vor.u32 %v76_v33, %v75_v31  ;;  %v80_v43 = vor.u32 %v79_v36, %v78_v34 }
  0x8a   :  { %v83_v44 = vor.u32 %v82_v39, %v81_v37  ;;  %v68_v25 = vshrl.u32 %v1775_v24, %v1873_v21 }
  0x8b   :  { %v92_v46 = vsel %vm84_vm1, %v71_v40, %v74_v41  ;;  %v96_v47 = vsel %vm84_vm1, %v74_v41, %v77_v42  ;;  %v93_v48 = vsel %vm87_vm2, %v80_v43, 920167782  ;;  %v89_v19 = vsel %vm87_vm2, %v77_v42, 2102212464 }
  0x8c   :  { %v97_v49 = vsel %vm87_vm2, %v83_v44, 1326507024  ;;  %v94_v50 = vsel %vm86_vm3, %v77_v42, %v93_v48  ;;  %v88_v34 = vsel %vm84_vm1, %v68_v25, %v71_v40  ;;  %v90_v36 = vsel %vm86_vm3, %v74_v41, %v89_v19 }
  0x8d   :  { %v98_v51 = vsel %vm86_vm3, %v80_v43, %v97_v49  ;;  %v95_v52 = vsel %vm85_vm4, %v92_v46, %v94_v50  ;;  %v91_v21 = vsel %vm85_vm4, %v88_v34, %v90_v36  ;;  %v364_v36 = vpop.permute.xlu0 %363  ;;  %vm195_vm1 = vweird.f32 %v1855_v8 }
  0x8e   :  { %v99_v53 = vsel %vm85_vm4, %v96_v47, %v98_v51  ;;  %v125_v58 = vand.u32 65535, %v95_v52  ;;  %v126_v59 = vshrl.u32 %v95_v52, 16  ;;  %v145_v49 = vmul.u32 %v1893_v45, %v91_v21 }
  0x8f   :  { %v103_v56 = vand.u32 65535, %v99_v53  ;;  %v104_v57 = vshrl.u32 %v99_v53, 16  ;;  %vm383_vm2 = vcmask 261120  }
  0x90   :  { %v128_v62 = vmul.u32 %v126_v59, %v101_v54  ;;  %v129_v63 = vmul.u32 %v125_v58, %v102_v55  ;;  %v127_v7 = vmul.u32 %v125_v58, %v101_v54  ;;  %v130_v12 = vmul.u32 %v126_v59, %v102_v55 }
  0x91   :  { %v106_v60 = vmul.u32 %v104_v57, %v101_v54  ;;  %v107_v61 = vmul.u32 %v103_v56, %v102_v55  ;;  %v105_v0 = vmul.u32 %v103_v56, %v101_v54  ;;  %v108_v6 = vmul.u32 %v104_v57, %v102_v55 }
  0x92   :  { %v131_v9 = vshll.u32 %v128_v62, 16  ;;  %v133_v14 = vshll.u32 %v129_v63, 16  ;;  %v132_v31 = vshrl.u32 %v128_v62, 16  ;;  %v134_v42 = vshrl.u32 %v129_v63, 16 }
  0x93   :  { %v109_v1 = vshll.u32 %v106_v60, 16  ;;  %v111_v10 = vshll.u32 %v107_v61, 16  ;;  %v110_v27 = vshrl.u32 %v106_v60, 16  ;;  %v112_v37 = vshrl.u32 %v107_v61, 16 }
  0x94   :  { %vm135_vm6 = vc.u32 %v127_v7, %v131_v9  ;;  %v137_v15 = vadd.s32 %v131_v9, %v127_v7 }
  0x95   :  { %vm113_vm5 = vc.u32 %v105_v0, %v109_v1  ;;  %v115_v11 = vadd.s32 %v109_v1, %v105_v0  ;;  %v136_v18 = vsel %vm135_vm6, 1, %v1774_v2 }
  0x96   :  { %v114_v13 = vsel %vm113_vm5, 1, %v1774_v2  ;;  %v138_v22 = vadd.s32 %v136_v18, %v130_v12  ;;  %vm139_vm8 = vc.u32 %v137_v15, %v133_v14  ;;  %v141_v46 = vadd.s32 %v137_v15, %v133_v14 }
  0x97   :  { %v116_v17 = vadd.s32 %v114_v13, %v108_v6  ;;  %vm117_vm7 = vc.u32 %v115_v11, %v111_v10  ;;  %v140_v30 = vsel %vm139_vm8, 1, %v1774_v2  ;;  %v1934_v6 = vld [vmem:[%s2417_s0 + $0x8] sm:$0xff]  ;;  %s1781_s0 = smov 112  }
  0x98   :  { %v118_v20 = vsel %vm117_vm7, 1, %v1774_v2  ;;  %v142_v33 = vadd.s32 %v140_v30, %v138_v22  ;;  %43 = vperm.xlu1 %1692, %v1934_v6  }
  0x99   :  { %v120_v28 = vadd.s32 %v118_v20, %v116_v17 }
  0x9a   :  { %v143_v43 = vadd.s32 %v142_v33, %v132_v31  ;;  %v370_v33 = vperm.slane %v1847_v3, 2 }
  0x9b   :  { %v121_v39 = vadd.s32 %v120_v28, %v110_v27 }
  0x9c   :  { %v144_v47 = vadd.s32 %v143_v43, %v134_v42 }
  0x9d   :  { %v122_v44 = vadd.s32 %v121_v39, %v112_v37 }
  0x9e   :  { %v148_v48 = vadd.s32 1, %v144_v47 }
  0x9f   :  { %vm147_vm9 = vc.u32 %v122_v44, %v141_v46  ;;  %v146_v23 = vadd.s32 %v141_v46, %v122_v44  ;;  %v373_v44 = vperm.slane %v1847_v3, 3  ;;  %v371_v46 = vmul.f32 %v370_v33, %v364_v36 }
  0xa0   :  { %v149_v50 = vsel %vm147_vm9, %v148_v48, %v144_v47 }
  0xa1   :  { %v150_v51 = vadd.s32 %v149_v50, %v145_v49  ;;  %v374_v50 = vadd.f32 %v373_v44, %v371_v46 }
  0xa3   :  { %v151_v40 = vadd.s32 536870912, %v150_v51 }
  0xa5   :  { %v152_v52 = vshrl.u32 %v151_v40, 30 }
  0xa7   :  { %v153_v53 = vshll.u32 %v152_v52, 30  ;;  %v176_v14 = vsub.s32 4, %v152_v52 }
  0xa9   :  { %v154_v41 = vsub.s32 %v150_v51, %v153_v53  ;;  %v177_v20 = vsel %vm54_vm12, %v176_v14, %v152_v52 }
  0xaa   :  { %v179_v27 = vsel %vm1940_vm13, 0, %v177_v20 }
  0xab   :  { %vm155_vm10 = vcmp.lt.s32.totalorder %v154_v41, 0  ;;  %v156_v54 = vsub.s32 0, %v154_v41  ;;  %v196_v34 = vadd.s32 3, %v179_v27 }
  0xad   :  { %v157_v55 = vsel %vm155_vm10, %v156_v54, %v154_v41  ;;  %v197_v21 = vand.u32 3, %v196_v34 }
  0xae   :  { %v158_v56 = vclz %v157_v55 }
  0xaf   :  { %vm199_vm14 = vcmp.eq.s32.totalorder %v197_v21, 0  ;;  %vm202_vm15 = vcmp.eq.s32.totalorder %v197_v21, 2  ;;  %vm198_vm0 = vcmp.lt.s32.totalorder %v197_v21, 2 }
  0xb0   :  { %v1603_v57 = vadd.s32 4294967294, %v158_v56 }
  0xb2   :  { %vm1604_vm11 = vcmp.lt.s32.totalorder %v1603_v57, 0 }
  0xb3   :  { %v161_v58 = vsel %vm1604_vm11, 0, %v1603_v57 }
  0xb4   :  { %v162_v59 = vsub.s32 32, %v161_v58  ;;  %v166_v60 = vsub.s32 4294967266, %v161_v58  ;;  %v163_v61 = vshll.u32 %v154_v41, %v161_v58 }
  0xb6   :  { %v164_v62 = vshrl.u32 %v146_v23, %v162_v59  ;;  %v167_v63 = vadd.s32 127, %v166_v60 }
  0xb8   :  { %v165_v45 = vor.u32 %v164_v62, %v163_v61  ;;  %v168_v0 = vshll.u32 %v167_v63, 23 }
  0xba   :  { %v169_v1 = vor.u32 4788187, %v168_v0  ;;  %v172_v9 = vcvt.s32.f32 %v165_v45 }
  0xbc   :  { %v170_v7 = vand.u32 2147483647, %v169_v1 }
  0xbe   :  { %v173_v10 = vmul.f32 %v172_v9, %v170_v7 }
  0xc0   :  { %v174_v11 = vxor.u32 2147483648, %v173_v10 }
  0xc2   :  { %v175_v13 = vsel %vm54_vm12, %v174_v11, %v173_v10 }
  0xc3   :  { %v178_v15 = vsel %vm1940_vm13, %v1855_v8, %v175_v13 }
  0xc4   :  { %v180_v17 = vmul.f32 %v178_v15, %v178_v15 }
  0xc6   :  { %v181_v18 = vmul.f32 -0.001358992, %v180_v17  ;;  %v188_v19 = vmul.f32 -0.00019511016, %v180_v17 }
  0xc8   :  { %v182_v22 = vadd.f32 0.041655596, %v181_v18  ;;  %v189_v25 = vadd.f32 0.008332121, %v188_v19 }
  0xca   :  { %v183_v28 = vmul.f32 %v182_v22, %v180_v17  ;;  %v190_v16 = vmul.f32 %v189_v25, %v180_v17 }
  0xcc   :  { %v184_v30 = vadd.f32 -0.4999988, %v183_v28  ;;  %v191_v31 = vadd.f32 -0.16666654, %v190_v16 }
  0xce   :  { %v185_v37 = vmul.f32 %v184_v30, %v180_v17  ;;  %v192_v39 = vmul.f32 %v191_v31, %v180_v17 }
  0xd0   :  { %v186_v42 = vadd.f32 1.0, %v185_v37  ;;  %v193_v43 = vadd.f32 1.0, %v192_v39 }
  0xd2   :  { %v194_v47 = vmul.f32 %v193_v43, %v178_v15  ;;  %v203_v48 = vxor.u32 2147483648, %v186_v42 }
  0xd4   :  { %v200_v49 = vxor.u32 2147483648, %v194_v47  ;;  %v204_v40 = vsel %vm202_vm15, %v203_v48, %v194_v47 }
  0xd6   :  { %v201_v51 = vsel %vm199_vm14, %v186_v42, %v200_v49 }
  0xd7   :  { %v205_v52 = vsel %vm198_vm0, %v201_v51, %v204_v40 }
  0xd8   :  { %v206_v53 = vsel %vm195_vm1, nan, %v205_v52 }
  0xd9   :  { %v1956_v41 = vadd.f32 %v374_v50, %v206_v53 }
  0xdb   :  { %1608 = vmatmul.msk.f32.vlgmr.msra.gmra.mxu0 %vm383_vm2, %v1956_v41 }
 0x10a   :  { %v44_v54 = vpop.permute.xlu1 %43 }
 0x10b   :  { %v48_v55 = vmul.f32 %v46_v4, %v44_v54 }
 0x10d   :  { %v1964_v56 = vadd.f32 %v49_v5, %v48_v55 }
 0x10f   :  { %v210_v57 = vand.u32 2139095040, %v1964_v56  ;;  %v207_v8 = vand.u32 2147483647, %v1964_v56  ;;  %vm209_vm15 = vcmp.lt.s32.totalorder %v1964_v56, 0 }
 0x111   :  { %v211_v58 = vshrl.u32 %v210_v57, 23  ;;  %v214_v60 = vand.u32 8388607, %v207_v8  ;;  %vm2034_vm0 = vcmp.le.f32.partialorder %v207_v8, 0.7853982 }
 0x113   :  { %v1605_v23 = vadd.s32 4294967169, %v211_v58  ;;  %v215_v63 = vor.u32 8388608, %v214_v60 }
 0x115   :  { %v217_v59 = vadd.s32 1, %v1605_v23  ;;  %v1983_v15 = vshll.u32 %v215_v63, 8 }
 0x117   :  { %vm218_vm3 = vcmp.gt.s32.totalorder %v217_v59, 0  ;;  %v256_v27 = vand.u32 65535, %v1983_v15  ;;  %v257_v30 = vshrl.u32 %v1983_v15, 16 }
 0x118   :  { %v219_v61 = vsel %vm218_vm3, %v217_v59, 0 }
 0x119   :  { %v221_v62 = vand.u32 31, %v219_v61  ;;  %v1970_v45 = vshrl.u32 %v219_v61, 5 }
 0x11b   :  { %v222_v4 = vsub.s32 32, %v221_v62  ;;  %v224_v5 = vshll.u32 %v1775_v24, %v221_v62  ;;  %v227_v0 = vshll.u32 %v1776_v26, %v221_v62  ;;  %v230_v1 = vshll.u32 %v1777_v29, %v221_v62 }
 0x11c   :  { %v233_v7 = vshll.u32 %v1778_v32, %v221_v62  ;;  %v236_v9 = vshll.u32 %v1779_v35, %v221_v62  ;;  %vm239_vm4 = vcmp.lt.s32.totalorder %v1970_v45, 1  ;;  %vm242_vm5 = vcmp.lt.s32.totalorder %v1970_v45, 4 }
 0x11d   :  { %v225_v10 = vshrl.u32 %v1776_v26, %v222_v4  ;;  %v228_v11 = vshrl.u32 %v1777_v29, %v222_v4  ;;  %v231_v12 = vshrl.u32 %v1778_v32, %v222_v4  ;;  %v234_v13 = vshrl.u32 %v1779_v35, %v222_v4 }
 0x11e   :  { %v237_v14 = vshrl.u32 %v1780_v38, %v222_v4  ;;  %vm241_vm6 = vcmp.lt.s32.totalorder %v1970_v45, 3  ;;  %vm240_vm7 = vcmp.lt.s32.totalorder %v1970_v45, 2  ;;  %v223_v52 = vshrl.u32 %v1775_v24, %v222_v4 }
 0x11f   :  { %v226_v17 = vor.u32 %v225_v10, %v224_v5  ;;  %v229_v18 = vor.u32 %v228_v11, %v227_v0  ;;  %v232_v19 = vor.u32 %v231_v12, %v230_v1  ;;  %v235_v20 = vor.u32 %v234_v13, %v233_v7 }
 0x120   :  { %v238_v22 = vor.u32 %v237_v14, %v236_v9 }
 0x121   :  { %v247_v26 = vsel %vm239_vm4, %v226_v17, %v229_v18  ;;  %v251_v29 = vsel %vm239_vm4, %v229_v18, %v232_v19  ;;  %v248_v32 = vsel %vm242_vm5, %v235_v20, 920167782  ;;  %v244_v57 = vsel %vm242_vm5, %v232_v19, 2102212464 }
 0x122   :  { %v252_v35 = vsel %vm242_vm5, %v238_v22, 1326507024  ;;  %v249_v38 = vsel %vm241_vm6, %v232_v19, %v248_v32  ;;  %v243_v62 = vsel %vm239_vm4, %v223_v52, %v226_v17  ;;  %v245_v24 = vsel %vm241_vm6, %v229_v18, %v244_v57 }
 0x123   :  { %v253_v25 = vsel %vm241_vm6, %v235_v20, %v252_v35  ;;  %v250_v28 = vsel %vm240_vm7, %v247_v26, %v249_v38  ;;  %v246_v9 = vsel %vm240_vm7, %v243_v62, %v245_v24  ;;  %vm350_vm5 = vweird.f32 %v1964_v56 }
 0x124   :  { %v254_v16 = vsel %vm240_vm7, %v251_v29, %v253_v25  ;;  %v280_v36 = vand.u32 65535, %v250_v28  ;;  %v281_v37 = vshrl.u32 %v250_v28, 16  ;;  %vm416_vm6 = vcmask 130048  }
 0x125   :  { %v258_v31 = vand.u32 65535, %v254_v16  ;;  %v259_v34 = vshrl.u32 %v254_v16, 16  ;;  %vm442_vm7 = vcmask 64512  }
 0x126   :  { %v283_v46 = vmul.u32 %v281_v37, %v256_v27  ;;  %v282_v48 = vmul.u32 %v280_v36, %v256_v27  ;;  %v284_v49 = vmul.u32 %v280_v36, %v257_v30  ;;  %v285_v51 = vmul.u32 %v281_v37, %v257_v30 }
 0x127   :  { %v260_v39 = vmul.u32 %v258_v31, %v256_v27  ;;  %v261_v42 = vmul.u32 %v259_v34, %v256_v27  ;;  %v262_v43 = vmul.u32 %v258_v31, %v257_v30  ;;  %v263_v50 = vmul.u32 %v259_v34, %v257_v30 }
 0x128   :  { %v286_v40 = vshll.u32 %v283_v46, 16  ;;  %v288_v58 = vshll.u32 %v284_v49, 16  ;;  %v287_v5 = vshrl.u32 %v283_v46, 16  ;;  %v289_v10 = vshrl.u32 %v284_v49, 16 }
 0x129   :  { %v264_v47 = vshll.u32 %v261_v42, 16  ;;  %v266_v53 = vshll.u32 %v262_v43, 16  ;;  %v265_v1 = vshrl.u32 %v261_v42, 16  ;;  %v267_v12 = vshrl.u32 %v262_v43, 16 }
 0x12a   :  { %vm290_vm9 = vc.u32 %v282_v48, %v286_v40  ;;  %v292_v23 = vadd.s32 %v286_v40, %v282_v48 }
 0x12b   :  { %vm268_vm8 = vc.u32 %v260_v39, %v264_v47  ;;  %v270_v55 = vadd.s32 %v264_v47, %v260_v39  ;;  %v291_v60 = vsel %vm290_vm9, 1, %v1774_v2 }
 0x12c   :  { %v269_v54 = vsel %vm268_vm8, 1, %v1774_v2  ;;  %v293_v61 = vadd.s32 %v291_v60, %v285_v51  ;;  %vm294_vm10 = vc.u32 %v292_v23, %v288_v58  ;;  %v296_v18 = vadd.s32 %v292_v23, %v288_v58 }
 0x12d   :  { %v271_v59 = vadd.s32 %v269_v54, %v263_v50  ;;  %vm272_vm11 = vc.u32 %v270_v55, %v266_v53  ;;  %v295_v63 = vsel %vm294_vm10, 1, %v1774_v2 }
 0x12e   :  { %v273_v4 = vsel %vm272_vm11, 1, %v1774_v2  ;;  %v297_v0 = vadd.s32 %v295_v63, %v293_v61  ;;  %v300_v2 = vmul.u32 %v1983_v15, %v246_v9 }
 0x12f   :  { %v275_v7 = vadd.s32 %v273_v4, %v271_v59 }
 0x130   :  { %v298_v11 = vadd.s32 %v297_v0, %v287_v5 }
 0x131   :  { %v276_v13 = vadd.s32 %v275_v7, %v265_v1 }
 0x132   :  { %v299_v14 = vadd.s32 %v298_v11, %v289_v10 }
 0x133   :  { %v277_v17 = vadd.s32 %v276_v13, %v267_v12 }
 0x134   :  { %v303_v19 = vadd.s32 1, %v299_v14 }
 0x135   :  { %vm302_vm12 = vc.u32 %v277_v17, %v296_v18  ;;  %v301_v28 = vadd.s32 %v296_v18, %v277_v17 }
 0x158   :  { %v2006_v21 = vpop.f32.mrf.mxu0 }
 0x159   :  { %493 = vrot.lane.b32.xlu2 %v2006_v21, %s1781_s0  ;;  %495 = vrot.lane.b32.xlu1 %v2006_v21, %s1782_s23 }
 0x161   :  { %367 = vperm.xlu2 %1693, %v1934_v6   ;;  %414 = vrot.lane.b32.xlu1 %v2006_v21, %s1783_s24  ;;  %v304_v6 = vsel %vm302_vm12, %v303_v19, %v299_v14 }
 0x162   :  { %v305_v20 = vadd.s32 %v304_v6, %v300_v2 }
 0x164   :  { %v306_v22 = vadd.s32 536870912, %v305_v20 }
 0x166   :  { %v307_v45 = vshrl.u32 %v306_v22, 30 }
 0x168   :  { %v308_v26 = vshll.u32 %v307_v45, 30  ;;  %v331_v57 = vsub.s32 4, %v307_v45 }
 0x169   :  { %546 = vrot.lane.b32.xlu1 %v2006_v21, %s1784_s25 }
 0x16a   :  { %v309_v29 = vsub.s32 %v305_v20, %v308_v26  ;;  %v332_v59 = vsel %vm209_vm15, %v331_v57, %v307_v45 }
 0x16b   :  { %v334_v61 = vsel %vm2034_vm0, 0, %v332_v59 }
 0x16c   :  { %v311_v32 = vsub.s32 0, %v309_v29  ;;  %vm310_vm13 = vcmp.lt.s32.totalorder %v309_v29, 0  ;;  %v351_v63 = vadd.s32 3, %v334_v61 }
 0x16e   :  { %v312_v35 = vsel %vm310_vm13, %v311_v32, %v309_v29  ;;  %v352_v0 = vand.u32 3, %v351_v63 }
 0x16f   :  { %v313_v38 = vclz %v312_v35 }
 0x170   :  { %vm354_vm1 = vcmp.eq.s32.totalorder %v352_v0, 0  ;;  %vm357_vm3 = vcmp.eq.s32.totalorder %v352_v0, 2  ;;  %vm353_vm4 = vcmp.lt.s32.totalorder %v352_v0, 2 }
 0x171   :  { %v1606_v25 = vadd.s32 4294967294, %v313_v38 }
 0x173   :  { %vm1607_vm14 = vcmp.lt.s32.totalorder %v1606_v25, 0 }
 0x174   :  { %v316_v15 = vsel %vm1607_vm14, 0, %v1606_v25 }
 0x175   :  { %v321_v27 = vsub.s32 4294967266, %v316_v15  ;;  %v317_v16 = vsub.s32 32, %v316_v15  ;;  %v318_v31 = vshll.u32 %v309_v29, %v316_v15 }
 0x177   :  { %v322_v30 = vadd.s32 127, %v321_v27  ;;  %v319_v34 = vshrl.u32 %v301_v28, %v317_v16 }
 0x179   :  { %v323_v36 = vshll.u32 %v322_v30, 23  ;;  %v320_v37 = vor.u32 %v319_v34, %v318_v31 }
 0x17b   :  { %v324_v39 = vor.u32 4788187, %v323_v36  ;;  %v327_v43 = vcvt.s32.f32 %v320_v37 }
 0x17d   :  { %v325_v42 = vand.u32 2147483647, %v324_v39 }
 0x17f   :  { %v328_v46 = vmul.f32 %v327_v43, %v325_v42 }
 0x181   :  { %v329_v47 = vxor.u32 2147483648, %v328_v46 }
 0x183   :  { %v330_v49 = vsel %vm209_vm15, %v329_v47, %v328_v46 }
 0x184   :  { %v333_v50 = vsel %vm2034_vm0, %v1964_v56, %v330_v49 }
 0x185   :  { %v335_v51 = vmul.f32 %v333_v50, %v333_v50 }
 0x187   :  { %v343_v40 = vmul.f32 -0.00019511016, %v335_v51  ;;  %v336_v52 = vmul.f32 -0.001358992, %v335_v51 }
 0x189   :  { %v344_v53 = vadd.f32 0.008332121, %v343_v40  ;;  %v337_v54 = vadd.f32 0.041655596, %v336_v52 }
 0x18b   :  { %v345_v55 = vmul.f32 %v344_v53, %v335_v51  ;;  %v338_v58 = vmul.f32 %v337_v54, %v335_v51 }
 0x18d   :  { %v346_v23 = vadd.f32 -0.16666654, %v345_v55  ;;  %v339_v60 = vadd.f32 -0.4999988, %v338_v58 }
 0x18f   :  { %v347_v8 = vmul.f32 %v346_v23, %v335_v51  ;;  %v340_v62 = vmul.f32 %v339_v60, %v335_v51 }
 0x191   :  { %v348_v24 = vadd.f32 1.0, %v347_v8  ;;  %v341_v4 = vadd.f32 1.0, %v340_v62 }
 0x193   :  { %v349_v5 = vmul.f32 %v348_v24, %v333_v50  ;;  %v358_v9 = vxor.u32 2147483648, %v341_v4 }
 0x195   :  { %v355_v7 = vxor.u32 2147483648, %v349_v5  ;;  %v359_v11 = vsel %vm357_vm3, %v358_v9, %v349_v5 }
 0x197   :  { %v356_v10 = vsel %vm354_vm1, %v341_v4, %v355_v7 }
 0x198   :  { %v360_v12 = vsel %vm353_vm4, %v356_v10, %v359_v11 }
 0x199   :  { %v361_v2 = vsel %vm350_vm5, nan, %v360_v12 }
 0x1b3   :  { %v494_v1 = vpop.permute.xlu2 %493 }
 0x1bb   :  { %v368_v13 = vpop.permute.xlu2 %367 }
 0x1bc   :  { %v372_v14 = vmul.f32 %v370_v33, %v368_v13 }
 0x1be   :  { %v375_v17 = vadd.f32 %v373_v44, %v372_v14 }
 0x1c0   :  { %v2048_v18 = vadd.f32 %v375_v17, %v361_v2 }
 0x1c2   :  { %1609 = vmatmul.msk.f32.gmra.mxu0 %vm383_vm2, %v2048_v18 }
 0x1cb   :  { %v496_v19 = vpop.permute.xlu1 %495 }
 0x1cc   :  { %1613 = vmatpush.xpose.msk.msra.mxu3 %vm416_vm6, %v496_v19 }
 0x1cf   :  { %1614 = vmatmul.msk.f32.vlgmr.msra.gmra.mxu3 %vm416_vm6, %v494_v1 }
 0x1d3   :  { %v415_v56 = vpop.permute.xlu1 %414 }
 0x1d4   :  { %1610 = vmatpush.xpose.msk.msra.mxu1 %vm416_vm6, %v415_v56 }
 0x1d7   :  { %1611 = vmatmul.msk.f32.vlgmr.msra.gmra.mxu1 %vm416_vm6, %v2006_v21 }
 0x1db   :  { %v547_v33 = vpop.permute.xlu1 %546 }
 0x1dc   :  { %567 = vmatpush.msrb.mxu1 %v547_v33 }
 0x23f   :  { %v2057_v3 = vpop.f32.mrf.mxu0 }
 0x240   :  { %657 = vrot.lane.b32.xlu1 %v2057_v3, %s1782_s23 }
 0x248   :  { %655 = vrot.lane.b32.xlu1 %v2057_v3, %s1781_s0 }
 0x250   :  { %578 = vrot.lane.b32.xlu1 %v2057_v3, %s1783_s24 }
 0x252   :  { %v518_v44 = vpop.f32.mrf.mxu3 }
 0x253   :  { %v521_v6 = vmul.f32 0.17677669, %v518_v44 }
 0x254   :  { %v438_v22 = vpop.f32.mrf.mxu1 }
 0x255   :  { %v522_v20 = vsel %vm442_vm7, %v521_v6, -inf  ;;  %v441_v45 = vmul.f32 0.17677669, %v438_v22 }
 0x256   :  { %523 = vmax.xlane.f32.xlu2 %v522_v20 }
 0x257   :  { %v443_v26 = vsel %vm442_vm7, %v441_v45, -inf }
 0x27a   :  { %444 = vmax.xlane.f32.xlu1 %v443_v26 }
 0x293   :  { %708 = vrot.lane.b32.xlu1 %v2057_v3, %s1784_s25 }
 0x2b2   :  { %v658_v29 = vpop.permute.xlu1 %657 }
 0x2b3   :  { %1619 = vmatpush.xpose.msk.msra.mxu2 %vm416_vm6, %v658_v29 }
 0x2ba   :  { %v656_v32 = vpop.permute.xlu1 %655 }
 0x2bb   :  { %1620 = vmatmul.msk.f32.vlgmr.msra.gmra.mxu2 %vm416_vm6, %v656_v32 }
 0x2c2   :  { %v579_v35 = vpop.permute.xlu1 %578 }
 0x2c3   :  { %1616 = vmatpush.xpose.msk.msra.mxu1 %vm416_vm6, %v579_v35 }
 0x2c9   :  { %v524_v38 = vpop.xlane.xlu2 %523 }
 0x2ca   :  { %v525_v25 = vsub.f32 %v521_v6, %v524_v38 }
 0x2cc   :  { %v526_v15 = vmul.f32 1.442695, %v525_v25 }
 0x2ce   :  { %1696 = vpow2.f32 %v526_v15 }
 0x2d4   :  { %v1697_v27 = vpop.eup %1696 }
 0x2d5   :  { %v528_v28 = vsel %vm442_vm7, %v1697_v27, 0.0 }
 0x2d6   :  { %529 = vadd.xlane.f32.xlu0 %v528_v28 }
 0x2ed   :  { %v445_v16 = vpop.xlane.xlu1 %444 }
 0x2ee   :  { %v446_v30 = vsub.f32 %v441_v45, %v445_v16  ;;  %v742_v16 = vld [vmem:[%s2420_s3 + $0x18] sm:$0xff] }
 0x2f0   :  { %v447_v31 = vmul.f32 1.442695, %v446_v30  ;;  %v741_v30 = vld [vmem:[%s2420_s3 + $0x10] sm:$0xff] }
 0x2f2   :  { %1698 = vpow2.f32 %v447_v31  ;;  %v740_v31 = vld [vmem:[%s2420_s3 + $0x8] sm:$0xff] }
 0x2f8   :  { %v1699_v34 = vpop.eup %1698 }
 0x2f9   :  { %v449_v36 = vsel %vm442_vm7, %v1699_v34, 0.0 }
 0x2fa   :  { %450 = vadd.xlane.f32.xlu2 %v449_v36 }
 0x305   :  { %v709_v55 = vpop.permute.xlu1 %708 }
 0x312   :  { %467 = vrot.lane.b32.xlu2 %v2006_v21, %s1785_s26 }
 0x33e   :  { %v680_v37 = vpop.f32.mrf.mxu2 }
 0x33f   :  { %v683_v39 = vmul.f32 0.17677669, %v680_v37 }
 0x341   :  { %v684_v42 = vsel %vm442_vm7, %v683_v39, -inf }
 0x342   :  { %685 = vmax.xlane.f32.xlu0 %v684_v42 }
 0x349   :  { %v530_v43 = vpop.xlane.xlu0 %529 }
 0x34a   :  { %1700 = vrcp.f32 %v530_v43  ;;  %v542_v49 = vand.u32 2147483648, %v530_v43  ;;  %v540_v51 = vand.u32 2147483647, %v530_v43  ;;  %vm536_vm9 = vweird.f32 %v530_v43 }
 0x34c   :  { %v543_v52 = vor.u32 1.1754944e-38, %v542_v49  ;;  %vm541_vm11 = vcmp.eq.f32.partialorder %v540_v51, 8.507059e+37 }
 0x350   :  { %v1701_v46 = vpop.eup %1700 }
 0x351   :  { %v532_v47 = vmul.f32 %v1701_v46, %v530_v43  ;;  %vm537_vm8 = vweird.f32 %v1701_v46 }
 0x352   :  { %vm538_vm10 = vmor %vm536_vm9, %vm537_vm8 }
 0x353   :  { %v533_v48 = vsub.f32 1.0, %v532_v47 }
 0x355   :  { %v534_v50 = vmul.f32 %v1701_v46, %v533_v48 }
 0x357   :  { %v535_v40 = vadd.f32 %v1701_v46, %v534_v50 }
 0x359   :  { %v539_v21 = vsel %vm538_vm10, %v1701_v46, %v535_v40 }
 0x35a   :  { %v544_v53 = vsel %vm541_vm11, %v543_v52, %v539_v21 }
 0x35b   :  { %v545_v54 = vmul.f32 %v1697_v27, %v544_v53 }
 0x35d   :  { %1615 = vmatmul.msk.f32.vlgmr.msrb.gmra.mxu1 %vm442_vm7, %v545_v54 }
 0x35e   :  { %729 = vmatpush.msrb.mxu1 %v709_v55 }
 0x365   :  { %1617 = vmatmul.msk.f32.vlgmr.msra.gmra.mxu1 %vm416_vm6, %v2057_v3 }
 0x36d   :  { %v451_v57 = vpop.xlane.xlu2 %450 }
 0x36e   :  { %1702 = vrcp.f32 %v451_v57  ;;  %v463_v8 = vand.u32 2147483648, %v451_v57  ;;  %v461_v62 = vand.u32 2147483647, %v451_v57  ;;  %vm457_vm13 = vweird.f32 %v451_v57 }
 0x370   :  { %v464_v63 = vor.u32 1.1754944e-38, %v463_v8  ;;  %vm462_vm15 = vcmp.eq.f32.partialorder %v461_v62, 8.507059e+37  ;;  %v1787_v62 = vmov 32.0  }
 0x374   :  { %v1703_v58 = vpop.eup %1702 }
 0x375   :  { %v453_v23 = vmul.f32 %v1703_v58, %v451_v57  ;;  %v468_v59 = vpop.permute.xlu2 %467  ;;  %vm458_vm12 = vweird.f32 %v1703_v58 }
 0x376   :  { %488 = vmatpush.msrb.mxu0 %v468_v59  ;;  %vm459_vm14 = vmor %vm457_vm13, %vm458_vm12 }
 0x377   :  { %v454_v60 = vsub.f32 1.0, %v453_v23 }
 0x379   :  { %v455_v61 = vmul.f32 %v1703_v58, %v454_v60 }
 0x37b   :  { %v456_v24 = vadd.f32 %v1703_v58, %v455_v61 }
 0x37d   :  { %v460_v4 = vsel %vm459_vm14, %v1703_v58, %v456_v24  ;;  %v2109_v58 = vld [vmem:[%s2421_s4] sm:$0x3f] }
 0x37e   :  { %v465_v5 = vsel %vm462_vm15, %v464_v63, %v460_v4  ;;  %v743_v23 = vperm.slane %v2109_v58, 0 }
 0x37f   :  { %v466_v0 = vmul.f32 %v1699_v34, %v465_v5  ;;  %v739_v34 = vld [vmem:[%s2420_s3] sm:$0xff] }
 0x381   :  { %1612 = vmatmul.msk.f32.vlgmr.msrb.gmra.mxu0 %vm442_vm7, %v466_v0 }
 0x3b5   :  { %v686_v1 = vpop.xlane.xlu0 %685 }
 0x3b6   :  { %v687_v7 = vsub.f32 %v683_v39, %v686_v1 }
 0x3b8   :  { %v688_v9 = vmul.f32 1.442695, %v687_v7 }
 0x3ba   :  { %1704 = vpow2.f32 %v688_v9 }
 0x3c0   :  { %v1705_v10 = vpop.eup %1704 }
 0x3c1   :  { %v690_v11 = vsel %vm442_vm7, %v1705_v10, 0.0 }
 0x3c2   :  { %691 = vadd.xlane.f32.xlu2 %v690_v11 }
 0x3da   :  { %v569_v12 = vpop.f32.mrf.mxu1 }
 0x3e2   :  { %v601_v13 = vpop.f32.mrf.mxu1 }
 0x3e3   :  { %v604_v14 = vmul.f32 0.17677669, %v601_v13 }
 0x3e5   :  { %v605_v2 = vsel %vm442_vm7, %v604_v14, -inf }
 0x3e6   :  { %606 = vmax.xlane.f32.xlu0 %v605_v2 }
 0x3fa   :  { %629 = vrot.lane.b32.xlu0 %v2057_v3, %s1785_s26 }
 0x3fe   :  { %v490_v21 = vpop.f32.mrf.mxu0 }
 0x435   :  { %v692_v17 = vpop.xlane.xlu2 %691 }
 0x436   :  { %1706 = vrcp.f32 %v692_v17  ;;  %v704_v44 = vand.u32 2147483648, %v692_v17  ;;  %v702_v20 = vand.u32 2147483647, %v692_v17  ;;  %vm698_vm1 = vweird.f32 %v692_v17 }
 0x438   :  { %v705_v45 = vor.u32 1.1754944e-38, %v704_v44  ;;  %vm703_vm4 = vcmp.eq.f32.partialorder %v702_v20, 8.507059e+37 }
 0x43c   :  { %v1707_v19 = vpop.eup %1706 }
 0x43d   :  { %v694_v56 = vmul.f32 %v1707_v19, %v692_v17  ;;  %vm699_vm0 = vweird.f32 %v1707_v19  ;;  %v835_v17 = vld [vmem:[%s2422_s5 + $0x18] sm:$0xff] }
 0x43e   :  { %vm700_vm3 = vmor %vm698_vm1, %vm699_vm0  ;;  %856 = vmatpush.msra.mxu0 %v835_v17 }
 0x43f   :  { %v695_v33 = vsub.f32 1.0, %v694_v56  ;;  %v833_v56 = vld [vmem:[%s2422_s5 + $0x8] sm:$0xff] }
 0x441   :  { %v696_v6 = vmul.f32 %v1707_v19, %v695_v33 }
 0x443   :  { %v697_v22 = vadd.f32 %v1707_v19, %v696_v6 }
 0x445   :  { %v701_v26 = vsel %vm700_vm3, %v1707_v19, %v697_v22  ;;  %v834_v19 = vld [vmem:[%s2422_s5 + $0x10] sm:$0xff] }
 0x446   :  { %v706_v29 = vsel %vm703_vm4, %v705_v45, %v701_v26  ;;  %857 = vmatpush.msra.mxu0 %v834_v19 }
 0x447   :  { %v707_v32 = vmul.f32 %v1705_v10, %v706_v29 }
 0x448   :  { %858 = vmatpush.msra.mxu0 %v833_v56 }
 0x449   :  { %1621 = vmatmul.msk.f32.vlgmr.msrb.gmra.mxu1 %vm442_vm7, %v707_v32 }
 0x459   :  { %v607_v3 = vpop.xlane.xlu0 %606 }
 0x45a   :  { %v608_v35 = vsub.f32 %v604_v14, %v607_v3 }
 0x45c   :  { %v609_v38 = vmul.f32 1.442695, %v608_v35 }
 0x45e   :  { %1708 = vpow2.f32 %v609_v38 }
 0x464   :  { %v1709_v25 = vpop.eup %1708 }
 0x465   :  { %v611_v15 = vsel %vm442_vm7, %v1709_v25, 0.0 }
 0x466   :  { %612 = vadd.xlane.f32.xlu0 %v611_v15 }
 0x46c   :  { %v630_v27 = vpop.permute.xlu0 %629 }
 0x46d   :  { %650 = vmatpush.msrb.mxu3 %v630_v27  ;;  %v826_v27 = vperm.slane %v2109_v58, 1 }
 0x46f   :  { %762 = vmatpush.msra.mxu3 %v742_v16 }
 0x471   :  { %763 = vmatpush.msra.mxu3 %v741_v30  ;;  %v829_v30 = vperm.slane %v2109_v58, 2 }
 0x473   :  { %764 = vmatpush.msra.mxu3 %v740_v31 }
 0x475   :  { %765 = vmatpush.msra.mxu3 %v739_v34 }
 0x47a   :  { %573 = vrot.lane.b32.xlu0 %v569_v12, %s1786_s27 }
 0x4c6   :  { %v731_v28 = vpop.f32.mrf.mxu1 }
 0x4c7   :  { %735 = vrot.lane.b32.xlu0 %v731_v28, %s1786_s27 }
 0x4d9   :  { %v613_v36 = vpop.xlane.xlu0 %612 }
 0x4da   :  { %1710 = vrcp.f32 %v613_v36  ;;  %v625_v43 = vand.u32 2147483648, %v613_v36  ;;  %v623_v47 = vand.u32 2147483647, %v613_v36  ;;  %vm619_vm8 = vweird.f32 %v613_v36 }
 0x4db   :  { %1712 = vrcp.f32 %v1787_v62 }
 0x4dc   :  { %v626_v49 = vor.u32 1.1754944e-38, %v625_v43  ;;  %vm624_vm10 = vcmp.eq.f32.partialorder %v623_v47, 8.507059e+37  ;;  %v880_v43 = vld [vmem:[%s2424_s7 + $0x58] sm:$0xff]  ;;  %v878_v47 = vld [vmem:[%s2424_s7 + $0x48] sm:$0xff] }
 0x4e0   :  { %v1711_v37 = vpop.eup %1710 }
 0x4e1   :  { %v615_v39 = vmul.f32 %v1711_v37, %v613_v36  ;;  %vm620_vm5 = vweird.f32 %v1711_v37  ;;  %v1713_v24 = vpop.eup %1712  ;;  %v884_v36 = vld [vmem:[%s2424_s7 + $0x78] sm:$0xff] }
 0x4e2   :  { %vm621_vm9 = vmor %vm619_vm8, %vm620_vm5  ;;  %v782_v63 = vmul.f32 32.0, %v1713_v24  ;;  %vm786_vm11 = vweird.f32 %v1713_v24  ;;  %886 = vmatpush.msrb.mxu2 %v884_v36 }
 0x4e3   :  { %v616_v42 = vsub.f32 1.0, %v615_v39  ;;  %v882_v39 = vld [vmem:[%s2424_s7 + $0x68] sm:$0xff] }
 0x4e4   :  { %v783_v4 = vsub.f32 1.0, %v782_v63 }
 0x4e5   :  { %v617_v46 = vmul.f32 %v1711_v37, %v616_v42  ;;  %v881_v42 = vld [vmem:[%s2424_s7 + $0x60] sm:$0xff] }
 0x4e6   :  { %v784_v5 = vmul.f32 %v1713_v24, %v783_v4 }
 0x4e7   :  { %v618_v48 = vadd.f32 %v1711_v37, %v617_v46  ;;  %v879_v46 = vld [vmem:[%s2424_s7 + $0x50] sm:$0xff] }
 0x4e8   :  { %v785_v0 = vadd.f32 %v1713_v24, %v784_v5 }
 0x4e9   :  { %v622_v50 = vsel %vm621_vm9, %v1711_v37, %v618_v48  ;;  %v883_v37 = vld [vmem:[%s2424_s7 + $0x70] sm:$0xff]  ;;  %v877_v48 = vld [vmem:[%s2424_s7 + $0x40] sm:$0xff] }
 0x4ea   :  { %v627_v51 = vsel %vm624_vm10, %v626_v49, %v622_v50  ;;  %v2114_v1 = vsel %vm786_vm11, %v1713_v24, %v785_v0  ;;  %887 = vmatpush.msrb.mxu2 %v883_v37  ;;  %v876_v49 = vld [vmem:[%s2424_s7 + $0x38] sm:$0xff]  ;;  %v875_v50 = vld [vmem:[%s2424_s7 + $0x30] sm:$0xff]  ;;  %v1694_v0 = vld [vmem:[%s2423_s6] ss:$0 sm:$0xff] }
 0x4eb   :  { %v628_v40 = vmul.f32 %v1709_v25, %v627_v51  ;;  %v874_v51 = vld [vmem:[%s2424_s7 + $0x28] sm:$0xff] }
 0x4ec   :  { %v574_v52 = vpop.permute.xlu0 %573  ;;  %888 = vmatpush.msrb.mxu2 %v882_v39 }
 0x4ed   :  { %1618 = vmatmul.msk.f32.vlgmr.msrb.gmra.mxu3 %vm442_vm7, %v628_v40  ;;  %v576_v53 = vsel %vm416_vm6, %v490_v21, %v574_v52  ;;  %v873_v40 = vld [vmem:[%s2424_s7 + $0x20] sm:$0xff]  ;;  %v872_v52 = vld [vmem:[%s2424_s7 + $0x18] sm:$0xff]  ;;  %v871_v21 = vld [vmem:[%s2424_s7 + $0x10] sm:$0xff] }
 0x4ee   :  { %889 = vmatpush.msrb.mxu2 %v881_v42 }
 0x4f0   :  { %890 = vmatpush.msrb.mxu2 %v880_v43 }
 0x4f2   :  { %891 = vmatpush.msrb.mxu2 %v879_v46 }
 0x4f4   :  { %892 = vmatpush.msrb.mxu2 %v878_v47  ;;  %v955_v47 = vperm.slane %v2109_v58, 3 }
 0x4f5   :  { %1622 = vmatmul.msk.f32.vlgmr.msra.gmra.mxu3 %vm383_vm2, %v576_v53  ;;  %v870_v53 = vld [vmem:[%s2424_s7 + $0x8] sm:$0xff] }
 0x4f6   :  { %893 = vmatpush.msrb.mxu2 %v877_v48 }
 0x4f8   :  { %894 = vmatpush.msrb.mxu2 %v876_v49 }
 0x4fa   :  { %895 = vmatpush.msrb.mxu2 %v875_v50  ;;  %v958_v50 = vperm.slane %v2109_v58, 4 }
 0x4fc   :  { %896 = vmatpush.msrb.mxu2 %v874_v51 }
 0x4fe   :  { %897 = vmatpush.msrb.mxu2 %v873_v40 }
 0x500   :  { %898 = vmatpush.msrb.mxu2 %v872_v52 }
 0x502   :  { %899 = vmatpush.msrb.mxu2 %v871_v21 }
 0x504   :  { %900 = vmatpush.msrb.mxu2 %v870_v53 }
 0x539   :  { %v736_v54 = vpop.permute.xlu0 %735 }
 0x570   :  { %v652_v55 = vpop.f32.mrf.mxu3 }
 0x571   :  { %v738_v57 = vsel %vm416_vm6, %v652_v55, %v736_v54  ;;  %v869_v55 = vld [vmem:[%s2424_s7] sm:$0xff] }
 0x572   :  { %1623 = vmatmul.msk.f32.gmra.mxu3 %vm383_vm2, %v738_v57  ;;  %901 = vmatpush.msrb.mxu2 %v869_v55 }
 0x578   :  { %v767_v59 = vpop.f32.mrf.mxu3 }
 0x579   :  { %v768_v60 = vadd.f32 %v767_v59, %v743_v23 }
 0x57b   :  { %v773_v8 = vadd.f32 %v768_v60, %v1956_v41 }
 0x57d   :  { %v775_v61 = vsel %vm383_vm2, %v773_v8, 0.0 }
 0x57e   :  { %776 = vadd.xlane.f32.xlu1 %v775_v61 }
 0x5f1   :  { %v777_v7 = vpop.xlane.xlu1 %776 }
 0x5f2   :  { %v788_v9 = vmul.f32 %v2114_v1, %v777_v7 }
 0x5f4   :  { %v790_v10 = vsub.f32 %v773_v8, %v788_v9 }
 0x5f5   :  { %v770_v11 = vpop.f32.mrf.mxu3 }
 0x5f6   :  { %v771_v12 = vadd.f32 %v770_v11, %v743_v23  ;;  %v792_v41 = vmul.f32 %v790_v10, %v790_v10 }
 0x5f8   :  { %v794_v13 = vsel %vm383_vm2, %v792_v41, 0.0  ;;  %v774_v14 = vadd.f32 %v771_v12, %v2048_v18  ;;  %v832_v18 = vld [vmem:[%s2422_s5] sm:$0xff] }
 0x5f9   :  { %795 = vadd.xlane.f32.xlu0 %v794_v13  ;;  %859 = vmatpush.msra.mxu0 %v832_v18 }
 0x5fa   :  { %v778_v2 = vsel %vm383_vm2, %v774_v14, 0.0 }
 0x5fb   :  { %779 = vadd.xlane.f32.xlu2 %v778_v2 }
 0x66c   :  { %v796_v33 = vpop.xlane.xlu0 %795 }
 0x66d   :  { %v800_v44 = vmul.f32 %v796_v33, %v2114_v1 }
 0x66e   :  { %v780_v6 = vpop.xlane.xlu2 %779 }
 0x66f   :  { %v802_v20 = vadd.f32 1e-05, %v800_v44  ;;  %v789_v22 = vmul.f32 %v2114_v1, %v780_v6 }
 0x671   :  { %1714 = vrsqrt.f32 %v802_v20  ;;  %v2134_v45 = vsub.f32 %v774_v14, %v789_v22  ;;  %vm810_vm13 = vweird.f32 %v802_v20  ;;  %v885_v14 = vperm.slane %v2109_v58, 5 }
 0x673   :  { %v793_v26 = vmul.f32 %v2134_v45, %v2134_v45 }
 0x675   :  { %v797_v29 = vsel %vm383_vm2, %v793_v26, 0.0 }
 0x676   :  { %798 = vadd.xlane.f32.xlu2 %v797_v29 }
 0x677   :  { %v1715_v32 = vpop.eup %1714 }
 0x678   :  { %v805_v3 = vmul.f32 %v1715_v32, %v802_v20  ;;  %vm811_vm12 = vweird.f32 %v1715_v32 }
 0x679   :  { %vm812_vm14 = vmor %vm810_vm13, %vm811_vm12 }
 0x67a   :  { %v806_v35 = vmul.f32 %v1715_v32, %v805_v3  ;;  %v1629_v3 = vld [vmem:[%s2419_s2 + $0x30] sm:$0xff] }
 0x67c   :  { %v807_v38 = vmul.f32 0.5, %v806_v35  ;;  %v1628_v35 = vld [vmem:[%s2419_s2 + $0x28] sm:$0xff] }
 0x67e   :  { %v808_v25 = vsub.f32 1.5, %v807_v38  ;;  %v1627_v38 = vld [vmem:[%s2419_s2 + $0x20] sm:$0xff] }
 0x680   :  { %v809_v15 = vmul.f32 %v1715_v32, %v808_v25 }
 0x682   :  { %v813_v28 = vsel %vm812_vm14, %v1715_v32, %v809_v15  ;;  %v1630_v32 = vld [vmem:[%s2419_s2 + $0x38] sm:$0xff] }
 0x683   :  { %v824_v16 = vmul.f32 %v813_v28, %v790_v10  ;;  %986 = vmatpush.msra.mxu1 %v1630_v32 }
 0x685   :  { %v827_v31 = vmul.f32 %v826_v27, %v824_v16  ;;  %987 = vmatpush.msra.mxu1 %v1629_v3 }
 0x687   :  { %v2141_v34 = vadd.f32 %v829_v30, %v827_v31  ;;  %988 = vmatpush.msra.mxu1 %v1628_v35 }
 0x689   :  { %1624 = vmatmul.msk.f32.vlgmr.msra.gmra.mxu0 %vm383_vm2, %v2141_v34  ;;  %989 = vmatpush.msra.mxu1 %v1627_v38 }
 0x6e9   :  { %v799_v54 = vpop.xlane.xlu2 %798 }
 0x6ea   :  { %v801_v57 = vmul.f32 %v799_v54, %v2114_v1 }
 0x6ec   :  { %v803_v23 = vadd.f32 1e-05, %v801_v57 }
 0x6ee   :  { %1716 = vrsqrt.f32 %v803_v23  ;;  %vm820_vm0 = vweird.f32 %v803_v23 }
 0x6f4   :  { %v1717_v59 = vpop.eup %1716 }
 0x6f5   :  { %v815_v60 = vmul.f32 %v1717_v59, %v803_v23  ;;  %vm821_vm15 = vweird.f32 %v1717_v59 }
 0x6f6   :  { %vm822_vm1 = vmor %vm820_vm0, %vm821_vm15 }
 0x6f7   :  { %v816_v8 = vmul.f32 %v1717_v59, %v815_v60 }
 0x6f9   :  { %v817_v61 = vmul.f32 0.5, %v816_v8 }
 0x6fb   :  { %v818_v62 = vsub.f32 1.5, %v817_v61 }
 0x6fd   :  { %v819_v24 = vmul.f32 %v1717_v59, %v818_v62 }
 0x6ff   :  { %v823_v63 = vsel %vm822_vm1, %v1717_v59, %v819_v24 }
 0x700   :  { %v825_v4 = vmul.f32 %v823_v63, %v2134_v45 }
 0x702   :  { %v828_v5 = vmul.f32 %v826_v27, %v825_v4 }
 0x704   :  { %v831_v7 = vadd.f32 %v829_v30, %v828_v5 }
 0x706   :  { %v861_v9 = vpop.f32.mrf.mxu0  ;;  %1625 = vmatmul.msk.f32.gmra.mxu0 %vm383_vm2, %v831_v7 }
 0x707   :  { %v862_v10 = vadd.f32 %v1694_v0, %v861_v9 }
 0x709   :  { %v867_v11 = vmax.f32 %v862_v10, 0.0 }
 0x70b   :  { %902 = vmatmul.f32.vlgmr.msrb.gmra.mxu2 %v867_v11 }
 0x783   :  { %v864_v12 = vpop.f32.mrf.mxu0 }
 0x784   :  { %v865_v41 = vadd.f32 %v1694_v0, %v864_v12 }
 0x786   :  { %v868_v13 = vmax.f32 %v865_v41, 0.0 }
 0x788   :  { %905 = vmatmul.f32.gmra.mxu2 %v868_v13 }
 0x78e   :  { %v903_v2 = vpop.f32.mrf.mxu2 }
 0x78f   :  { %v904_v17 = vadd.f32 %v903_v2, %v885_v14 }
 0x791   :  { %v909_v19 = vadd.f32 %v904_v17, %v2141_v34 }
 0x793   :  { %v911_v56 = vsel %vm383_vm2, %v909_v19, 0.0 }
 0x794   :  { %912 = vadd.xlane.f32.xlu2 %v911_v56 }
 0x807   :  { %v913_v18 = vpop.xlane.xlu2 %912 }
 0x808   :  { %v917_v33 = vmul.f32 %v913_v18, %v2114_v1 }
 0x80a   :  { %v919_v44 = vsub.f32 %v909_v19, %v917_v33 }
 0x80b   :  { %v906_v6 = vpop.f32.mrf.mxu2 }
 0x80c   :  { %v921_v20 = vmul.f32 %v919_v44, %v919_v44  ;;  %v907_v22 = vadd.f32 %v906_v6, %v885_v14 }
 0x80e   :  { %v923_v45 = vsel %vm383_vm2, %v921_v20, 0.0  ;;  %v910_v26 = vadd.f32 %v907_v22, %v831_v7 }
 0x80f   :  { %924 = vadd.xlane.f32.xlu2 %v923_v45 }
 0x810   :  { %v914_v29 = vsel %vm383_vm2, %v910_v26, 0.0 }
 0x817   :  { %915 = vadd.xlane.f32.xlu2 %v914_v29 }
 0x882   :  { %v925_v25 = vpop.xlane.xlu2 %924 }
 0x883   :  { %v929_v15 = vmul.f32 %v925_v25, %v2114_v1 }
 0x885   :  { %v931_v27 = vadd.f32 1e-05, %v929_v15 }
 0x887   :  { %1718 = vrsqrt.f32 %v931_v27  ;;  %vm939_vm4 = vweird.f32 %v931_v27 }
 0x88a   :  { %v916_v28 = vpop.xlane.xlu2 %915 }
 0x88b   :  { %v918_v16 = vmul.f32 %v916_v28, %v2114_v1 }
 0x88d   :  { %v1719_v30 = vpop.eup %1718  ;;  %v920_v31 = vsub.f32 %v910_v26, %v918_v16 }
 0x88e   :  { %v934_v34 = vmul.f32 %v1719_v30, %v931_v27  ;;  %vm940_vm3 = vweird.f32 %v1719_v30 }
 0x88f   :  { %v922_v36 = vmul.f32 %v920_v31, %v920_v31  ;;  %vm941_vm5 = vmor %vm939_vm4, %vm940_vm3 }
 0x890   :  { %v935_v37 = vmul.f32 %v1719_v30, %v934_v34 }
 0x891   :  { %v926_v39 = vsel %vm383_vm2, %v922_v36, 0.0 }
 0x892   :  { %v936_v42 = vmul.f32 0.5, %v935_v37  ;;  %927 = vadd.xlane.f32.xlu1 %v926_v39 }
 0x894   :  { %v937_v43 = vsub.f32 1.5, %v936_v42 }
 0x896   :  { %v938_v46 = vmul.f32 %v1719_v30, %v937_v43 }
 0x898   :  { %v942_v48 = vsel %vm941_vm5, %v1719_v30, %v938_v46 }
 0x899   :  { %v953_v49 = vmul.f32 %v942_v48, %v919_v44 }
 0x89b   :  { %v956_v51 = vmul.f32 %v955_v47, %v953_v49 }
 0x89d   :  { %v2222_v40 = vadd.f32 %v958_v50, %v956_v51 }
 0x89f   :  { %1631 = vmatmul.msk.f32.vlgmr.msra.gmra.mxu1 %vm383_vm2, %v2222_v40 }
 0x905   :  { %v928_v52 = vpop.xlane.xlu1 %927 }
 0x906   :  { %v930_v21 = vmul.f32 %v928_v52, %v2114_v1 }
 0x908   :  { %v932_v53 = vadd.f32 1e-05, %v930_v21 }
 0x90a   :  { %1720 = vrsqrt.f32 %v932_v53  ;;  %vm949_vm9 = vweird.f32 %v932_v53 }
 0x910   :  { %v1721_v54 = vpop.eup %1720 }
 0x911   :  { %v944_v55 = vmul.f32 %v1721_v54, %v932_v53  ;;  %vm950_vm8 = vweird.f32 %v1721_v54 }
 0x912   :  { %vm951_vm10 = vmor %vm949_vm9, %vm950_vm8 }
 0x913   :  { %v945_v57 = vmul.f32 %v1721_v54, %v944_v55 }
 0x915   :  { %v946_v23 = vmul.f32 0.5, %v945_v57 }
 0x917   :  { %v947_v59 = vsub.f32 1.5, %v946_v23 }
 0x919   :  { %v948_v60 = vmul.f32 %v1721_v54, %v947_v59 }
 0x91b   :  { %v952_v58 = vsel %vm951_vm10, %v1721_v54, %v948_v60 }
 0x91c   :  { %v991_v8 = vpop.f32.mrf.mxu1  ;;  %v954_v61 = vmul.f32 %v952_v58, %v920_v31 }
 0x91d   :  { %1075 = vrot.lane.b32.xlu2 %v991_v8, %s1781_s0  ;;  %1077 = vrot.lane.b32.xlu0 %v991_v8, %s1782_s23 }
 0x91e   :  { %998 = vrot.lane.b32.xlu1 %v991_v8, %s1783_s24  ;;  %v957_v62 = vmul.f32 %v955_v47, %v954_v61 }
 0x920   :  { %v2230_v24 = vadd.f32 %v958_v50, %v957_v62 }
 0x922   :  { %1632 = vmatmul.msk.f32.gmra.mxu1 %vm383_vm2, %v2230_v24 }
 0x977   :  { %v1076_v5 = vpop.permute.xlu2 %1075 }
 0x98f   :  { %v1078_v63 = vpop.permute.xlu0 %1077 }
 0x990   :  { %v999_v4 = vpop.permute.xlu1 %998  ;;  %1636 = vmatpush.xpose.msk.msrb.mxu1 %vm416_vm6, %v1078_v63 }
 0x991   :  { %1633 = vmatpush.xpose.msk.msrb.mxu3 %vm416_vm6, %v999_v4 }
 0x993   :  { %1637 = vmatmul.msk.f32.vlgmr.msrb.gmra.mxu1 %vm416_vm6, %v1076_v5 }
 0x994   :  { %1634 = vmatmul.msk.f32.vlgmr.msrb.gmra.mxu3 %vm416_vm6, %v991_v8 }
 0x99f   :  { %v2238_v0 = vpop.f32.mrf.mxu1 }
 0xa10   :  { %v1100_v7 = vpop.f32.mrf.mxu1 }
 0xa11   :  { %v1103_v9 = vmul.f32 0.17677669, %v1100_v7 }
 0xa13   :  { %v1104_v10 = vsel %vm442_vm7, %v1103_v9, -inf }
 0xa14   :  { %1105 = vmax.xlane.f32.xlu0 %v1104_v10 }
 0xa17   :  { %v1021_v11 = vpop.f32.mrf.mxu3 }
 0xa18   :  { %v1024_v12 = vmul.f32 0.17677669, %v1021_v11 }
 0xa1a   :  { %v1025_v41 = vsel %vm442_vm7, %v1024_v12, -inf }
 0xa1b   :  { %1026 = vmax.xlane.f32.xlu2 %v1025_v41  ;;  %v1647_v41 = vld [vmem:[%s2420_s3 + $0x30] sm:$0xff] }
 0xa28   :  { %1128 = vrot.lane.b32.xlu0 %v991_v8, %s1784_s25 }
 0xa33   :  { %1239 = vrot.lane.b32.xlu2 %v2238_v0, %s1782_s23 }
 0xa3b   :  { %1049 = vrot.lane.b32.xlu2 %v991_v8, %s1785_s26 }
 0xa87   :  { %v1106_v13 = vpop.xlane.xlu0 %1105 }
 0xa88   :  { %v1107_v14 = vsub.f32 %v1103_v9, %v1106_v13  ;;  %v1646_v13 = vld [vmem:[%s2420_s3 + $0x28] sm:$0xff] }
 0xa8a   :  { %v1108_v2 = vmul.f32 1.442695, %v1107_v14 }
 0xa8c   :  { %1722 = vpow2.f32 %v1108_v2 }
 0xa8e   :  { %v1027_v17 = vpop.xlane.xlu2 %1026 }
 0xa8f   :  { %v1028_v19 = vsub.f32 %v1024_v12, %v1027_v17  ;;  %v1648_v12 = vld [vmem:[%s2420_s3 + $0x38] sm:$0xff] }
 0xa91   :  { %v1029_v56 = vmul.f32 1.442695, %v1028_v19 }
 0xa92   :  { %v1723_v18 = vpop.eup %1722 }
 0xa93   :  { %1724 = vpow2.f32 %v1029_v56  ;;  %v1110_v33 = vsel %vm442_vm7, %v1723_v18, 0.0 }
 0xa94   :  { %1111 = vadd.xlane.f32.xlu1 %v1110_v33 }
 0xa96   :  { %v1240_v44 = vpop.permute.xlu2 %1239 }
 0xa99   :  { %v1725_v6 = vpop.eup %1724 }
 0xa9a   :  { %v1129_v20 = vpop.permute.xlu0 %1128  ;;  %v1031_v22 = vsel %vm442_vm7, %v1725_v6, 0.0 }
 0xa9b   :  { %1032 = vadd.xlane.f32.xlu0 %v1031_v22  ;;  %1149 = vmatpush.msra.mxu3 %v1129_v20 }
 0xa9d   :  { %1642 = vmatpush.xpose.msk.msrb.mxu3 %vm416_vm6, %v1240_v44 }
 0xa9e   :  { %v1050_v45 = vpop.permute.xlu2 %1049 }
 0xa9f   :  { %1070 = vmatpush.msrb.mxu0 %v1050_v45 }
 0xaad   :  { %1237 = vrot.lane.b32.xlu1 %v2238_v0, %s1781_s0 }
 0xab5   :  { %1160 = vrot.lane.b32.xlu1 %v2238_v0, %s1783_s24 }
 0xb07   :  { %v1112_v26 = vpop.xlane.xlu1 %1111 }
 0xb08   :  { %1726 = vrcp.f32 %v1112_v26  ;;  %v1124_v38 = vand.u32 2147483648, %v1112_v26  ;;  %v1122_v15 = vand.u32 2147483647, %v1112_v26  ;;  %vm1118_vm12 = vweird.f32 %v1112_v26 }
 0xb0a   :  { %v1125_v16 = vor.u32 1.1754944e-38, %v1124_v38  ;;  %vm1123_vm14 = vcmp.eq.f32.partialorder %v1122_v15, 8.507059e+37 }
 0xb0e   :  { %v1727_v29 = vpop.eup %1726  ;;  %v1033_v32 = vpop.xlane.xlu0 %1032 }
 0xb0f   :  { %v1114_v3 = vmul.f32 %v1727_v29, %v1112_v26  ;;  %1728 = vrcp.f32 %v1033_v32  ;;  %vm1119_vm11 = vweird.f32 %v1727_v29  ;;  %v1045_v37 = vand.u32 2147483648, %v1033_v32 }
 0xb10   :  { %vm1120_vm13 = vmor %vm1118_vm12, %vm1119_vm11  ;;  %v1043_v43 = vand.u32 2147483647, %v1033_v32  ;;  %vm1039_vm0 = vweird.f32 %v1033_v32 }
 0xb11   :  { %v1115_v35 = vsub.f32 1.0, %v1114_v3  ;;  %v1046_v47 = vor.u32 1.1754944e-38, %v1045_v37 }
 0xb12   :  { %vm1044_vm3 = vcmp.eq.f32.partialorder %v1043_v43, 8.507059e+37 }
 0xb13   :  { %v1116_v25 = vmul.f32 %v1727_v29, %v1115_v35 }
 0xb15   :  { %v1729_v27 = vpop.eup %1728  ;;  %v1117_v28 = vadd.f32 %v1727_v29, %v1116_v25 }
 0xb16   :  { %v1035_v30 = vmul.f32 %v1729_v27, %v1033_v32  ;;  %vm1040_vm15 = vweird.f32 %v1729_v27 }
 0xb17   :  { %v1121_v31 = vsel %vm1120_vm13, %v1727_v29, %v1117_v28  ;;  %vm1041_vm1 = vmor %vm1039_vm0, %vm1040_vm15 }
 0xb18   :  { %v1126_v34 = vsel %vm1123_vm14, %v1125_v16, %v1121_v31  ;;  %v1036_v36 = vsub.f32 1.0, %v1035_v30 }
 0xb19   :  { %v1127_v39 = vmul.f32 %v1723_v18, %v1126_v34 }
 0xb1a   :  { %v1037_v42 = vmul.f32 %v1729_v27, %v1036_v36 }
 0xb1b   :  { %1638 = vmatmul.msk.f32.vlgmr.msra.gmra.mxu3 %vm442_vm7, %v1127_v39 }
 0xb1c   :  { %v1038_v46 = vadd.f32 %v1729_v27, %v1037_v42  ;;  %v2291_v42 = vld [vmem:[%s2421_s4 + $0x8] sm:$0x3f] }
 0xb1d   :  { %v1326_v43 = vperm.slane %v2291_v42, 0 }
 0xb1e   :  { %v1042_v48 = vsel %vm1041_vm1, %v1729_v27, %v1038_v46 }
 0xb1f   :  { %v1047_v49 = vsel %vm1044_vm3, %v1046_v47, %v1042_v48  ;;  %v1238_v50 = vpop.permute.xlu1 %1237 }
 0xb20   :  { %v1048_v51 = vmul.f32 %v1725_v6, %v1047_v49 }
 0xb22   :  { %1635 = vmatmul.msk.f32.vlgmr.msrb.gmra.mxu0 %vm442_vm7, %v1048_v51 }
 0xb23   :  { %1643 = vmatmul.msk.f32.vlgmr.msrb.gmra.mxu3 %vm416_vm6, %v1238_v50 }
 0xb27   :  { %v1161_v52 = vpop.permute.xlu1 %1160 }
 0xb28   :  { %1639 = vmatpush.xpose.msk.msra.mxu0 %vm416_vm6, %v1161_v52 }
 0xb2b   :  { %1640 = vmatmul.msk.f32.vlgmr.msra.gmra.mxu0 %vm416_vm6, %v2238_v0 }
 0xb9e   :  { %v1151_v21 = vpop.f32.mrf.mxu3 }
 0xb9f   :  { %v2259_v53 = vpop.f32.mrf.mxu0 }
 0xba6   :  { %v1262_v54 = vpop.f32.mrf.mxu3 }
 0xba7   :  { %v1265_v55 = vmul.f32 0.17677669, %v1262_v54 }
 0xba8   :  { %v1183_v57 = vpop.f32.mrf.mxu0 }
 0xba9   :  { %v1186_v23 = vmul.f32 0.17677669, %v1183_v57  ;;  %v1266_v59 = vsel %vm442_vm7, %v1265_v55, -inf }
 0xbaa   :  { %1267 = vmax.xlane.f32.xlu2 %v1266_v59 }
 0xbab   :  { %v1187_v60 = vsel %vm442_vm7, %v1186_v23, -inf }
 0xbac   :  { %1188 = vmax.xlane.f32.xlu1 %v1187_v60  ;;  %v1654_v60 = vld [vmem:[%s2422_s5 + $0x38] sm:$0xff] }
 0xbad   :  { %1433 = vmatpush.msra.mxu3 %v1654_v60 }
 0xbc5   :  { %1211 = vrot.lane.b32.xlu1 %v2238_v0, %s1785_s26 }
 0xc1d   :  { %v1268_v58 = vpop.xlane.xlu2 %1267 }
 0xc1e   :  { %v1269_v8 = vsub.f32 %v1265_v55, %v1268_v58  ;;  %v1653_v58 = vld [vmem:[%s2422_s5 + $0x30] sm:$0xff] }
 0xc1f   :  { %v1189_v61 = vpop.xlane.xlu1 %1188  ;;  %1434 = vmatpush.msra.mxu3 %v1653_v58 }
 0xc20   :  { %v1270_v62 = vmul.f32 1.442695, %v1269_v8  ;;  %v1190_v63 = vsub.f32 %v1186_v23, %v1189_v61  ;;  %v1652_v8 = vld [vmem:[%s2422_s5 + $0x28] sm:$0xff] }
 0xc21   :  { %1435 = vmatpush.msra.mxu3 %v1652_v8 }
 0xc22   :  { %1730 = vpow2.f32 %v1270_v62  ;;  %v1191_v4 = vmul.f32 1.442695, %v1190_v63 }
 0xc24   :  { %1732 = vpow2.f32 %v1191_v4 }
 0xc28   :  { %v1731_v5 = vpop.eup %1730 }
 0xc29   :  { %v1272_v7 = vsel %vm442_vm7, %v1731_v5, 0.0 }
 0xc2a   :  { %v1733_v9 = vpop.eup %1732  ;;  %1273 = vadd.xlane.f32.xlu0 %v1272_v7 }
 0xc2b   :  { %v1193_v10 = vsel %vm442_vm7, %v1733_v9, 0.0 }
 0xc2c   :  { %1194 = vadd.xlane.f32.xlu2 %v1193_v10 }
 0xc37   :  { %v1212_v11 = vpop.permute.xlu1 %1211 }
 0xc38   :  { %1232 = vmatpush.msra.mxu1 %v1212_v11 }
 0xc3a   :  { %1345 = vmatpush.msrb.mxu1 %v1648_v12  ;;  %v1402_v12 = vperm.slane %v2291_v42, 1 }
 0xc3c   :  { %1346 = vmatpush.msrb.mxu1 %v1647_v41 }
 0xc3e   :  { %1290 = vrot.lane.b32.xlu0 %v2238_v0, %s1784_s25  ;;  %v1645_v0 = vld [vmem:[%s2420_s3 + $0x20] sm:$0xff]  ;;  %1347 = vmatpush.msrb.mxu1 %v1646_v13  ;;  %s1591_s3 = sshll.u32 %s1788_s21, 4  ;;  %s1592_s3 = int_to_ptr.vmem [resolvable:$true] %s1591_s3 }
 0xc40   :  { %1348 = vmatpush.msrb.mxu1 %v1645_v0  ;;  %v1405_v0 = vperm.slane %v2291_v42, 2 }
 0xc44   :  { %1155 = vrot.lane.b32.xlu2 %v1151_v21, %s1786_s27 }
 0xc9d   :  { %v1274_v14 = vpop.xlane.xlu0 %1273 }
 0xc9e   :  { %1734 = vrcp.f32 %v1274_v14  ;;  %v1286_v44 = vand.u32 2147483648, %v1274_v14  ;;  %v1284_v20 = vand.u32 2147483647, %v1274_v14  ;;  %vm1280_vm5 = vweird.f32 %v1274_v14 }
 0xc9f   :  { %v1195_v2 = vpop.xlane.xlu2 %1194 }
 0xca0   :  { %1736 = vrcp.f32 %v1195_v2  ;;  %v1207_v45 = vand.u32 2147483648, %v1195_v2  ;;  %v1205_v32 = vand.u32 2147483647, %v1195_v2  ;;  %v1287_v3 = vor.u32 1.1754944e-38, %v1286_v44  ;;  %v1667_v44 = vld [vmem:[%s2424_s7 + $0xd0] sm:$0xff] }
 0xca1   :  { %vm1285_vm10 = vcmp.eq.f32.partialorder %v1284_v20, 8.507059e+37  ;;  %vm1201_vm11 = vweird.f32 %v1195_v2  ;;  %v1665_v20 = vld [vmem:[%s2424_s7 + $0xc0] sm:$0xff] }
 0xca2   :  { %v1208_v15 = vor.u32 1.1754944e-38, %v1207_v45  ;;  %vm1206_vm13 = vcmp.eq.f32.partialorder %v1205_v32, 8.507059e+37  ;;  %v1663_v45 = vld [vmem:[%s2424_s7 + $0xb0] sm:$0xff]  ;;  %v1660_v32 = vld [vmem:[%s2424_s7 + $0x98] sm:$0xff] }
 0xca4   :  { %v1735_v17 = vpop.eup %1734 }
 0xca5   :  { %v1276_v19 = vmul.f32 %v1735_v17, %v1274_v14  ;;  %vm1281_vm4 = vweird.f32 %v1735_v17 }
 0xca6   :  { %v1737_v56 = vpop.eup %1736  ;;  %vm1282_vm9 = vmor %vm1280_vm5, %vm1281_vm4 }
 0xca7   :  { %v1277_v18 = vsub.f32 1.0, %v1276_v19  ;;  %v1197_v33 = vmul.f32 %v1737_v56, %v1195_v2  ;;  %vm1202_vm8 = vweird.f32 %v1737_v56  ;;  %v1156_v34 = vpop.permute.xlu2 %1155  ;;  %v1671_v19 = vld [vmem:[%s2424_s7 + $0xf0] sm:$0xff] }
 0xca8   :  { %vm1203_vm12 = vmor %vm1201_vm11, %vm1202_vm8  ;;  %v1158_v36 = vsel %vm416_vm6, %v2259_v53, %v1156_v34  ;;  %vm1553_vm11 = vcmask 1040384  }
 0xca9   :  { %v1278_v6 = vmul.f32 %v1735_v17, %v1277_v18  ;;  %v1198_v22 = vsub.f32 1.0, %v1197_v33  ;;  %v1669_v18 = vld [vmem:[%s2424_s7 + $0xe0] sm:$0xff]  ;;  %v1668_v33 = vld [vmem:[%s2424_s7 + $0xd8] sm:$0xff] }
 0xcab   :  { %v1279_v26 = vadd.f32 %v1735_v17, %v1278_v6  ;;  %v1199_v29 = vmul.f32 %v1737_v56, %v1198_v22  ;;  %v1666_v6 = vld [vmem:[%s2424_s7 + $0xc8] sm:$0xff]  ;;  %v1664_v22 = vld [vmem:[%s2424_s7 + $0xb8] sm:$0xff] }
 0xcad   :  { %v1283_v35 = vsel %vm1282_vm9, %v1735_v17, %v1279_v26  ;;  %v1200_v38 = vadd.f32 %v1737_v56, %v1199_v29  ;;  %v1672_v17 = vld [vmem:[%s2424_s7 + $0xf8] sm:$0xff]  ;;  %v1662_v26 = vld [vmem:[%s2424_s7 + $0xa8] sm:$0xff]  ;;  %v1661_v29 = vld [vmem:[%s2424_s7 + $0xa0] sm:$0xff] }
 0xcae   :  { %v1288_v25 = vsel %vm1285_vm10, %v1287_v3, %v1283_v35  ;;  %1464 = vmatpush.msra.mxu2 %v1672_v17 }
 0xcaf   :  { %v1204_v27 = vsel %vm1203_vm12, %v1737_v56, %v1200_v38  ;;  %v1289_v28 = vmul.f32 %v1731_v5, %v1288_v25  ;;  %v1670_v56 = vld [vmem:[%s2424_s7 + $0xe8] sm:$0xff]  ;;  %vm1584_vm12 = vcmask 25600  }
 0xcb0   :  { %v1209_v16 = vsel %vm1206_vm13, %v1208_v15, %v1204_v27  ;;  %v1291_v30 = vpop.permute.xlu0 %1290  ;;  %1465 = vmatpush.msra.mxu2 %v1671_v19  ;;  %v1659_v27 = vld [vmem:[%s2424_s7 + $0x90] sm:$0xff] }
 0xcb1   :  { %1311 = vmatpush.msrb.mxu0 %v1291_v30  ;;  %v1210_v31 = vmul.f32 %v1733_v9, %v1209_v16  ;;  %v1657_v16 = vld [vmem:[%s2424_s7 + $0x80] sm:$0xff] }
 0xcb2   :  { %1644 = vmatmul.msk.f32.vlgmr.msrb.gmra.mxu0 %vm442_vm7, %v1289_v28  ;;  %1466 = vmatpush.msra.mxu2 %v1670_v56  ;;  %v1658_v28 = vld [vmem:[%s2424_s7 + $0x88] sm:$0xff]  ;;  %v1695_v30 = vld [vmem:[%s2423_s6 + $0x1] ss:$0 sm:$0xff] }
 0xcb3   :  { %1641 = vmatmul.msk.f32.vlgmr.msra.gmra.mxu1 %vm442_vm7, %v1210_v31 }
 0xcb4   :  { %1467 = vmatpush.msra.mxu2 %v1669_v18 }
 0xcb6   :  { %1468 = vmatpush.msra.mxu2 %v1668_v33 }
 0xcb8   :  { %1469 = vmatpush.msra.mxu2 %v1667_v44 }
 0xcba   :  { %1470 = vmatpush.msra.mxu2 %v1666_v6 }
 0xcbb   :  { %1649 = vmatmul.msk.f32.vlgmr.msrb.gmra.mxu1 %vm383_vm2, %v1158_v36 }
 0xcbc   :  { %1471 = vmatpush.msra.mxu2 %v1665_v20 }
 0xcbe   :  { %1472 = vmatpush.msra.mxu2 %v1664_v22 }
 0xcc0   :  { %1473 = vmatpush.msra.mxu2 %v1663_v45 }
 0xcc2   :  { %1474 = vmatpush.msra.mxu2 %v1662_v26  ;;  %v1559_v26 = vld [vmem:[%s2425_s8 + $0x18] sm:$0xff] }
 0xcc3   :  { %1576 = vmatpush.msra.mxu0 %v1559_v26 }
 0xcc4   :  { %1475 = vmatpush.msra.mxu2 %v1661_v29  ;;  %v1558_v29 = vld [vmem:[%s2425_s8 + $0x10] sm:$0xff] }
 0xcc5   :  { %1577 = vmatpush.msra.mxu0 %v1558_v29 }
 0xcc6   :  { %1476 = vmatpush.msra.mxu2 %v1660_v32 }
 0xcc8   :  { %1477 = vmatpush.msra.mxu2 %v1659_v27 }
 0xcca   :  { %1478 = vmatpush.msra.mxu2 %v1658_v28 }
 0xccc   :  { %1479 = vmatpush.msra.mxu2 %v1657_v16 }
 0xd2f   :  { %v1313_v37 = vpop.f32.mrf.mxu0 }
 0xd30   :  { %1317 = vrot.lane.b32.xlu0 %v1313_v37, %s1786_s27  ;;  %v1234_v39 = vpop.f32.mrf.mxu1  ;;  %s1593_s27 = sshll.u32 %s2426_s9, 4  ;;  %s1594_s27 = int_to_ptr.hbm [resolvable:$true] %s1593_s27 }
 0xd38   :  { %v1350_v46 = vpop.f32.mrf.mxu1 }
 0xd39   :  { %v1351_v47 = vadd.f32 %v1350_v46, %v1326_v43 }
 0xd3b   :  { %v1356_v48 = vadd.f32 %v1351_v47, %v2222_v40 }
 0xd3d   :  { %v1358_v49 = vsel %vm383_vm2, %v1356_v48, 0.0 }
 0xd5a   :  { %1359 = vadd.xlane.f32.xlu0 %v1358_v49 }
 0xda2   :  { %v1318_v50 = vpop.permute.xlu0 %1317 }
 0xda3   :  { %v1320_v51 = vsel %vm416_vm6, %v1234_v39, %v1318_v50 }
 0xda4   :  { %1650 = vmatmul.msk.f32.gmra.mxu1 %vm383_vm2, %v1320_v51 }
 0xdcd   :  { %v1360_v52 = vpop.xlane.xlu0 %1359 }
 0xdce   :  { %v1364_v21 = vmul.f32 %v1360_v52, %v2114_v1 }
 0xdd0   :  { %v1366_v53 = vsub.f32 %v1356_v48, %v1364_v21 }
 0xdd2   :  { %v1368_v54 = vmul.f32 %v1366_v53, %v1366_v53 }
 0xdd4   :  { %v1370_v55 = vsel %vm383_vm2, %v1368_v54, 0.0 }
 0xdd5   :  { %1371 = vadd.xlane.f32.xlu2 %v1370_v55  ;;  %v1463_v55 = vperm.slane %v2291_v42, 5 }
 0xe21   :  { %v1353_v57 = vpop.f32.mrf.mxu1 }
 0xe22   :  { %v1354_v23 = vadd.f32 %v1353_v57, %v1326_v43 }
 0xe24   :  { %v1357_v40 = vadd.f32 %v1354_v23, %v2230_v24  ;;  %v1651_v24 = vld [vmem:[%s2422_s5 + $0x20] sm:$0xff] }
 0xe25   :  { %1436 = vmatpush.msra.mxu3 %v1651_v24 }
 0xe26   :  { %v1361_v59 = vsel %vm383_vm2, %v1357_v40, 0.0 }
 0xe27   :  { %1362 = vadd.xlane.f32.xlu1 %v1361_v59 }
 0xe48   :  { %v1372_v61 = vpop.xlane.xlu2 %1371 }
 0xe49   :  { %v1376_v62 = vmul.f32 %v1372_v61, %v2114_v1 }
 0xe4b   :  { %v1378_v63 = vadd.f32 1e-05, %v1376_v62 }
 0xe4d   :  { %1738 = vrsqrt.f32 %v1378_v63  ;;  %vm1386_vm7 = vweird.f32 %v1378_v63 }
 0xe53   :  { %v1739_v4 = vpop.eup %1738 }
 0xe54   :  { %v1381_v5 = vmul.f32 %v1739_v4, %v1378_v63  ;;  %vm1387_vm6 = vweird.f32 %v1739_v4 }
 0xe55   :  { %vm1388_vm14 = vmor %vm1386_vm7, %vm1387_vm6 }
 0xe56   :  { %v1382_v7 = vmul.f32 %v1739_v4, %v1381_v5 }
 0xe58   :  { %v1383_v9 = vmul.f32 0.5, %v1382_v7 }
 0xe5a   :  { %v1384_v10 = vsub.f32 1.5, %v1383_v9 }
 0xe5c   :  { %v1385_v11 = vmul.f32 %v1739_v4, %v1384_v10 }
 0xe5e   :  { %v1389_v41 = vsel %vm1388_vm14, %v1739_v4, %v1385_v11 }
 0xe5f   :  { %v1400_v13 = vmul.f32 %v1389_v41, %v1366_v53 }
 0xe61   :  { %v1403_v14 = vmul.f32 %v1402_v12, %v1400_v13 }
 0xe63   :  { %v2321_v2 = vadd.f32 %v1405_v0, %v1403_v14 }
 0xe65   :  { %1655 = vmatmul.msk.f32.vlgmr.msra.gmra.mxu3 %vm383_vm2, %v2321_v2 }
 0xe9a   :  { %v1363_v3 = vpop.xlane.xlu1 %1362 }
 0xe9b   :  { %v1365_v35 = vmul.f32 %v1363_v3, %v2114_v1  ;;  %v1557_v3 = vld [vmem:[%s2425_s8 + $0x8] sm:$0xff] }
 0xe9c   :  { %1578 = vmatpush.msra.mxu0 %v1557_v3 }
 0xe9d   :  { %v1367_v38 = vsub.f32 %v1357_v40, %v1365_v35  ;;  %v1533_v35 = vperm.slane %v2291_v42, 3 }
 0xe9f   :  { %v1369_v25 = vmul.f32 %v1367_v38, %v1367_v38 }
 0xea1   :  { %v1373_v15 = vsel %vm383_vm2, %v1369_v25, 0.0  ;;  %v1536_v25 = vperm.slane %v2291_v42, 4 }
 0xea2   :  { %1374 = vadd.xlane.f32.xlu0 %v1373_v15 }
 0xee8   :  { %v1438_v31 = vpop.f32.mrf.mxu3 }
 0xee9   :  { %v1439_v34 = vadd.f32 %v1695_v30, %v1438_v31 }
 0xeeb   :  { %v1444_v36 = vmax.f32 %v1439_v34, 0.0 }
 0xeed   :  { %1480 = vmatmul.f32.vlgmr.msra.gmra.mxu2 %v1444_v36 }
 0xf15   :  { %v1375_v37 = vpop.xlane.xlu0 %1374 }
 0xf16   :  { %v1377_v39 = vmul.f32 %v1375_v37, %v2114_v1 }
 0xf18   :  { %v1379_v43 = vadd.f32 1e-05, %v1377_v39 }
 0xf1a   :  { %1740 = vrsqrt.f32 %v1379_v43  ;;  %vm1396_vm0 = vweird.f32 %v1379_v43 }
 0xf20   :  { %v1741_v46 = vpop.eup %1740 }
 0xf21   :  { %v1391_v47 = vmul.f32 %v1741_v46, %v1379_v43  ;;  %vm1397_vm15 = vweird.f32 %v1741_v46 }
 0xf22   :  { %vm1398_vm1 = vmor %vm1396_vm0, %vm1397_vm15 }
 0xf23   :  { %v1392_v48 = vmul.f32 %v1741_v46, %v1391_v47 }
 0xf25   :  { %v1393_v49 = vmul.f32 0.5, %v1392_v48 }
 0xf27   :  { %v1394_v50 = vsub.f32 1.5, %v1393_v49 }
 0xf29   :  { %v1395_v51 = vmul.f32 %v1741_v46, %v1394_v50 }
 0xf2b   :  { %v1399_v52 = vsel %vm1398_vm1, %v1741_v46, %v1395_v51 }
 0xf2c   :  { %v1401_v21 = vmul.f32 %v1399_v52, %v1367_v38 }
 0xf2e   :  { %v1404_v53 = vmul.f32 %v1402_v12, %v1401_v21 }
 0xf30   :  { %v1407_v54 = vadd.f32 %v1405_v0, %v1404_v53 }
 0xf32   :  { %1656 = vmatmul.msk.f32.gmra.mxu3 %vm383_vm2, %v1407_v54 }
 0xf70   :  { %v1481_v57 = vpop.f32.mrf.mxu2 }
 0xf71   :  { %v1482_v23 = vadd.f32 %v1481_v57, %v1463_v55 }
 0xf73   :  { %v1487_v40 = vadd.f32 %v1482_v23, %v2321_v2 }
 0xf75   :  { %v1489_v59 = vsel %vm383_vm2, %v1487_v40, 0.0 }
 0xf76   :  { %1490 = vadd.xlane.f32.xlu0 %v1489_v59 }
 0xfb5   :  { %v1441_v60 = vpop.f32.mrf.mxu3 }
 0xfb6   :  { %v1442_v58 = vadd.f32 %v1695_v30, %v1441_v60 }
 0xfb8   :  { %v1445_v8 = vmax.f32 %v1442_v58, 0.0  ;;  %v1746_v58 = vld [vmem:[%s2418_s1] sm:$0x1f] }
 0xfba   :  { %1483 = vmatmul.f32.gmra.mxu2 %v1445_v8  ;;  %v1560_v8 = vperm.slane %v1746_v58, 4 }
 0xfe9   :  { %v1491_v24 = vpop.xlane.xlu0 %1490 }
 0xfea   :  { %v1495_v61 = vmul.f32 %v1491_v24, %v2114_v1 }
 0xfec   :  { %v1497_v62 = vsub.f32 %v1487_v40, %v1495_v61 }
 0xfee   :  { %v1499_v63 = vmul.f32 %v1497_v62, %v1497_v62 }
 0xff0   :  { %v1501_v4 = vsel %vm383_vm2, %v1499_v63, 0.0 }
 0xff1   :  { %1502 = vadd.xlane.f32.xlu1 %v1501_v4 }
0x103d   :  { %v1484_v5 = vpop.f32.mrf.mxu2 }
0x103e   :  { %v1485_v7 = vadd.f32 %v1484_v5, %v1463_v55 }
0x1040   :  { %v1488_v9 = vadd.f32 %v1485_v7, %v1407_v54 }
0x1042   :  { %v1492_v10 = vsel %vm383_vm2, %v1488_v9, 0.0 }
0x1043   :  { %1493 = vadd.xlane.f32.xlu2 %v1492_v10 }
0x1064   :  { %v1503_v14 = vpop.xlane.xlu1 %1502 }
0x1065   :  { %v1507_v2 = vmul.f32 %v1503_v14, %v2114_v1 }
0x1067   :  { %v1509_v17 = vadd.f32 1e-05, %v1507_v2 }
0x1069   :  { %1742 = vrsqrt.f32 %v1509_v17  ;;  %vm1517_vm4 = vweird.f32 %v1509_v17 }
0x106f   :  { %v1743_v19 = vpop.eup %1742 }
0x1070   :  { %v1512_v56 = vmul.f32 %v1743_v19, %v1509_v17  ;;  %vm1518_vm3 = vweird.f32 %v1743_v19 }
0x1071   :  { %vm1519_vm5 = vmor %vm1517_vm4, %vm1518_vm3 }
0x1072   :  { %v1513_v18 = vmul.f32 %v1743_v19, %v1512_v56 }
0x1074   :  { %v1514_v33 = vmul.f32 0.5, %v1513_v18 }
0x1076   :  { %v1515_v44 = vsub.f32 1.5, %v1514_v33 }
0x1078   :  { %v1516_v6 = vmul.f32 %v1743_v19, %v1515_v44 }
0x107a   :  { %v1520_v45 = vsel %vm1519_vm5, %v1743_v19, %v1516_v6 }
0x107b   :  { %v1531_v38 = vmul.f32 %v1520_v45, %v1497_v62 }
0x107d   :  { %v1534_v15 = vmul.f32 %v1533_v35, %v1531_v38 }
0x107f   :  { %v1537_v16 = vadd.f32 %v1536_v25, %v1534_v15 }
0x1081   :  { %v1539_v34 = vsel %vm383_vm2, %v1537_v16, 0.0 }
0x1082   :  { %v1540_v37 = vrot.slane %v1539_v34, 4 }
0x1084   :  { %v1541_v47 = vadd.f32 %v1540_v37, %v1539_v34 }
0x1086   :  { %v1542_v49 = vrot.slane %v1541_v47, 2 }
0x1088   :  { %v1543_v21 = vadd.f32 %v1542_v49, %v1541_v47 }
0x108a   :  { %v1544_v54 = vrot.slane %v1543_v21, 1 }
0x108c   :  { %v1545_v23 = vadd.f32 %v1544_v54, %v1543_v21 }
0x10b6   :  { %v1494_v11 = vpop.xlane.xlu2 %1493 }
0x10b7   :  { %v1496_v12 = vmul.f32 %v1494_v11, %v2114_v1 }
0x10b9   :  { %v1498_v41 = vsub.f32 %v1488_v9, %v1496_v12 }
0x10bb   :  { %v1500_v13 = vmul.f32 %v1498_v41, %v1498_v41 }
0x10bd   :  { %v1504_v0 = vsel %vm383_vm2, %v1500_v13, 0.0 }
0x10be   :  { %1505 = vadd.xlane.f32.xlu0 %v1504_v0 }
0x1131   :  { %v1506_v20 = vpop.xlane.xlu0 %1505 }
0x1132   :  { %v1508_v22 = vmul.f32 %v1506_v20, %v2114_v1  ;;  %v1556_v1 = vld [vmem:[%s2425_s8] sm:$0xff] }
0x1133   :  { %1579 = vmatpush.msra.mxu0 %v1556_v1 }
0x1134   :  { %v1510_v32 = vadd.f32 1e-05, %v1508_v22 }
0x1136   :  { %1744 = vrsqrt.f32 %v1510_v32  ;;  %vm1527_vm9 = vweird.f32 %v1510_v32 }
0x113c   :  { %v1745_v27 = vpop.eup %1744 }
0x113d   :  { %v1522_v28 = vmul.f32 %v1745_v27, %v1510_v32  ;;  %vm1528_vm8 = vweird.f32 %v1745_v27 }
0x113e   :  { %vm1529_vm10 = vmor %vm1527_vm9, %vm1528_vm8 }
0x113f   :  { %v1523_v30 = vmul.f32 %v1745_v27, %v1522_v28 }
0x1141   :  { %v1524_v31 = vmul.f32 0.5, %v1523_v30 }
0x1143   :  { %v1525_v36 = vsub.f32 1.5, %v1524_v31 }
0x1145   :  { %v1526_v39 = vmul.f32 %v1745_v27, %v1525_v36 }
0x1147   :  { %v1530_v43 = vsel %vm1529_vm10, %v1745_v27, %v1526_v39 }
0x1148   :  { %v1532_v46 = vmul.f32 %v1530_v43, %v1498_v41 }
0x114a   :  { %v1535_v48 = vmul.f32 %v1533_v35, %v1532_v46 }
0x114c   :  { %v1538_v42 = vadd.f32 %v1536_v25, %v1535_v48 }
0x114e   :  { %v1546_v50 = vsel %vm383_vm2, %v1538_v42, 0.0 }
0x114f   :  { %v1547_v51 = vrot.slane %v1546_v50, 4 }
0x1151   :  { %v1548_v52 = vadd.f32 %v1547_v51, %v1546_v50 }
0x1153   :  { %v1549_v53 = vrot.slane %v1548_v52, 2 }
0x1155   :  { %v1550_v55 = vadd.f32 %v1549_v53, %v1548_v52 }
0x1157   :  { %v1551_v57 = vrot.slane %v1550_v55, 1 }
0x1159   :  { %v1552_v40 = vadd.f32 %v1551_v57, %v1550_v55 }
0x115b   :  { %v1554_v59 = vsel %vm1553_vm11, %v1545_v23, %v1552_v40 }
0x115c   :  { %v1555_v60 = vmul.f32 0.125, %v1554_v59 }
0x115e   :  { %1673 = vmatmul.msk.f32.vlgmr.msra.gmra.mxu0 %vm383_vm2, %v1555_v60 }
0x11db   :  { %v1581_v24 = vpop.f32.mrf.mxu0 }
0x11dc   :  { %v1582_v61 = vadd.f32 %v1581_v24, %v1560_v8 }
0x11de   :  { %1585 = vst.msk [vmem:[#allocation2] sm:$0x3] %vm1584_vm12, %v1582_v61 }
0x11df   :  { %1596 = dma.vmem_to_hbm [thread:$0]  %s1592_s3, 32, %s1594_s27, [#allocation3]  }
0x11e0   :  { %1771 = dma.done.wait [#allocation3], 32  }
0x11e1   :  { %1772 = vsyncadd [#allocation3], 4294967264 }
0x11e2   :  { %1601 = vsyncpa [#allocation3], 1 }

</bundles_post_ra>
